<compile_context>
chip_gen: v5e
topology: v5e:2x2
jax: 0.10.0
libtpu: 0.0.40
codegen_flags: <defaults>
</compile_context>

<pallas_src>
import functools

import jax
import jax.numpy as jnp
from jax import lax
from jax.experimental import pallas as pl
from jax.experimental.pallas import tpu as pltpu


# ----------------------------------------------------------------------------
# Pallas kernel: full GATLayer forward (fused, lane/sublane padded)
# ----------------------------------------------------------------------------
def gat_layer_kernel(num_types, negative_slope,
                     h_ref, e_ref, S_ref, Dm_ref, et_ref,
                     WnT_ref, WeT_ref,
                     w1eT_ref, w1nT_ref,
                     w2aT_ref, w2bT_ref, w2cT_ref,
                     wsaT_ref, wsbT_ref, wscT_ref,
                     W2aT_ref, W2bT_ref, W2cT_ref,
                     zf_ref, ew_ref):
    f32 = jnp.float32
    bf16 = jnp.bfloat16
    slope = jnp.float32(negative_slope)
    eps = jnp.float32(1e-12)
    TN = (((0,), (0,)), ((), ()))      # contract leading (edge) axis of both -> lhs^T @ rhs

    S = S_ref[...]                     # (EP, NP) bf16 one-hot src (exact 0/1, never upcast)
    Dm = Dm_ref[...]                   # (EP, NP) bf16 one-hot dst
    et = et_ref[...]                   # (EP, TP) bf16 one-hot edge type

    def leaky(x):
        return jnp.where(x >= 0, x, slope * x)

    def seg_softmax(scores, M):
        # Segment softmax of per-edge scores (E,1) over groups given by one-hot M (E,N).
        # Shift by the GLOBAL max (segment softmax is shift-invariant to any constant);
        # `eps` guards all-zero padded rows / groups whose exp() fully underflows.
        gmax = jnp.max(scores, axis=0, keepdims=True)                               # (1,1)
        ex = jnp.exp(scores - gmax)                                                 # (E,1) f32
        gsum = lax.dot_general(M, ex.astype(bf16), TN,
                               preferred_element_type=f32)                          # (N,1)
        esum = jnp.dot(M, gsum.astype(bf16), preferred_element_type=f32)            # (E,1)
        return ex * pl.reciprocal(esum + eps, approx=True)

    # -------- Stage 1: WeightedAggEdge (edge weighting, per-src softmax) --------
    z = jnp.dot(h_ref[...], WnT_ref[...], preferred_element_type=f32)       # (NP, FnP) f32
    ew0 = jnp.dot(e_ref[...], WeT_ref[...], preferred_element_type=f32)     # (EP, FeP) f32
    z_bf = z.astype(bf16)
    z_src = jnp.dot(S, z_bf, preferred_element_type=f32)                    # (EP, FnP) f32
    z_dst = jnp.dot(Dm, z_bf, preferred_element_type=f32)                   # (EP, FnP) f32

    # attention over cat([e_ft, src_ft]) done piecewise (no concatenated copy)
    e1 = leaky(jnp.dot(ew0, w1eT_ref[...], preferred_element_type=f32)
               + jnp.dot(z_src, w1nT_ref[...], preferred_element_type=f32))  # (EP, 1)
    gamma = seg_softmax(e1, S)                                                # per-src softmax
    ew = gamma * ew0                                                          # (EP, FeP) f32
    ew_ref[...] = ew                                                          # lane-dense store

    # -------- Stage 2: BaseGAT_Modified (per-dst softmax), no cat2 copy ---------
    e2 = leaky(jnp.dot(z_src, w2aT_ref[...], preferred_element_type=f32)
               + jnp.dot(ew, w2bT_ref[...], preferred_element_type=f32)
               + jnp.dot(z_dst, w2cT_ref[...], preferred_element_type=f32))   # (EP, 1)
    alpha = seg_softmax(e2, Dm)                                                # per-dst softmax

    # -------- Stage 3: SemLevelGAT (semantic softmax over edge types) -----------
    # "weighted" pieces (alpha * cat2) in bf16; used for zphi and re-scaled for the scatter.
    wa = (alpha * z_src).astype(bf16)                                          # (EP, FnP)
    wb = (alpha * ew).astype(bf16)                                             # (EP, FeP)
    wc = (alpha * z_dst).astype(bf16)                                          # (EP, FnP)

    zphi_a = lax.dot_general(et, wa, TN, preferred_element_type=f32)           # (TP, FnP)
    zphi_b = lax.dot_general(et, wb, TN, preferred_element_type=f32)           # (TP, FeP)
    zphi_c = lax.dot_general(et, wc, TN, preferred_element_type=f32)           # (TP, FnP)

    wphi = leaky(jnp.dot(zphi_a, wsaT_ref[...], preferred_element_type=f32)
                 + jnp.dot(zphi_b, wsbT_ref[...], preferred_element_type=f32)
                 + jnp.dot(zphi_c, wscT_ref[...], preferred_element_type=f32))  # (TP, 1)
    # mask padded edge-type rows out of the semantic softmax
    tmask = lax.broadcasted_iota(jnp.int32, wphi.shape, 0) < num_types
    wphi = jnp.where(tmask, wphi, jnp.float32(-1e30))
    m = jnp.max(wphi, axis=0, keepdims=True)
    expw = jnp.where(tmask, jnp.exp(wphi - m), jnp.float32(0.0))
    beta = expw * pl.reciprocal(jnp.sum(expw, axis=0, keepdims=True), approx=True)  # (TP, 1)

    edge_beta = jnp.dot(et.astype(f32), beta, preferred_element_type=f32)      # (EP, 1)
    scale = alpha * edge_beta                                                  # (EP, 1) f32

    # Z = Dm^T @ (alpha * beta_type * cat2), scattered per 128-wide piece (bf16 operands)
    Za = lax.dot_general(Dm, (scale * z_src).astype(bf16), TN,
                         preferred_element_type=f32)                           # (NP, FnP)
    Zb = lax.dot_general(Dm, (scale * ew).astype(bf16), TN,
                         preferred_element_type=f32)                           # (NP, FeP)
    Zc = lax.dot_general(Dm, (scale * z_dst).astype(bf16), TN,
                         preferred_element_type=f32)                           # (NP, FnP)

    # fused fc2 over the three concatenated pieces; kept in f32 for output fidelity
    zf_ref[...] = (jnp.dot(Za, W2aT_ref[...], preferred_element_type=f32)
                   + jnp.dot(Zb, W2bT_ref[...], preferred_element_type=f32)
                   + jnp.dot(Zc, W2cT_ref[...], preferred_element_type=f32))   # (NP, OutP)


# ----------------------------------------------------------------------------
# Wrapper: padding, bf16 incidence matrices, pallas_call
# ----------------------------------------------------------------------------
def _round_up(x, m):
    return ((x + m - 1) // m) * m


def _pad2(x, rows, cols):
    return jnp.pad(x, ((0, rows - x.shape[0]), (0, cols - x.shape[1])))


def gat_layer_forward(h, e, src, dst, etype_idx, params, *, T, out_dim):
    N, node_dim = h.shape
    E, edge_dim = e.shape
    Wn, We, w1, w2, wsem, W2 = params
    Fn = Wn.shape[0]
    Fe = We.shape[0]

    f32 = jnp.float32
    bf16 = jnp.bfloat16
    LANE = 128
    SUB = 16                                    # bf16 sublane packing for the edge axis
    # N is the contraction axis of every (E,N) incidence matmul: lane-align it.
    # (A 256-multiple fills the 256-wide MXU on v6e/v7x; 128 is already optimal on v5e.)
    NP = max(LANE, _round_up(N, LANE))
    EP = max(SUB, _round_up(E, SUB))
    TP = max(8, _round_up(T, 8))
    DnP = max(LANE, _round_up(node_dim, LANE))
    DeP = max(LANE, _round_up(edge_dim, LANE))
    FnP = _round_up(Fn, LANE)
    FeP = _round_up(Fe, LANE)
    OutP = _round_up(out_dim, LANE)
    DzP = FnP + FeP + FnP

    # Zero-padded node / edge features (padded rows/cols are exactly zero).
    h_p = _pad2(h.astype(f32), NP, DnP)
    e_p = _pad2(e.astype(f32), EP, DeP)

    # One-hot incidence matrices in bf16 (0/1 exact; f32 accumulation in kernel).
    # Padded edges use out-of-range indices -> all-zero one-hot rows, so they contribute
    # nothing to any segment sum, the zphi reduction, or the final scatter.
    pad_e = EP - E
    i32 = jnp.int32
    src_p = jnp.concatenate([src.astype(i32), jnp.full((pad_e,), NP, i32)])
    dst_p = jnp.concatenate([dst.astype(i32), jnp.full((pad_e,), NP, i32)])
    ety_p = jnp.concatenate([etype_idx.astype(i32), jnp.full((pad_e,), TP, i32)])
    S = jax.nn.one_hot(src_p, NP, dtype=bf16)             # (EP, NP)
    Dm = jax.nn.one_hot(dst_p, NP, dtype=bf16)            # (EP, NP)
    et = jax.nn.one_hot(ety_p, TP, dtype=bf16)            # (EP, TP)

    # nn.Linear weights are (out, in); the kernel consumes transposed, zero-padded pieces.
    WnT = _pad2(jnp.transpose(Wn), DnP, FnP)              # (DnP, FnP)
    WeT = _pad2(jnp.transpose(We), DeP, FeP)              # (DeP, FeP)
    # stage-1 attention: input cat([e_ft, src_ft])
    w1eT = _pad2(w1[:, :Fe].T, FeP, 1)
    w1nT = _pad2(w1[:, Fe:].T, FnP, 1)
    # stage-2 attention: input cat([z_src, e_weighted, z_dst])
    w2aT = _pad2(w2[:, :Fn].T, FnP, 1)
    w2bT = _pad2(w2[:, Fn:Fn + Fe].T, FeP, 1)
    w2cT = _pad2(w2[:, Fn + Fe:].T, FnP, 1)
    # semantic attention (same concat layout)
    wsaT = _pad2(wsem[:, :Fn].T, FnP, 1)
    wsbT = _pad2(wsem[:, Fn:Fn + Fe].T, FeP, 1)
    wscT = _pad2(wsem[:, Fn + Fe:].T, FnP, 1)
    # fc2 split across the concatenated input dim, lane-padded output
    W2t = jnp.transpose(W2)                               # (Dz, out_dim)
    W2aT = _pad2(W2t[:Fn], FnP, OutP)
    W2bT = _pad2(W2t[Fn:Fn + Fe], FeP, OutP)
    W2cT = _pad2(W2t[Fn + Fe:], FnP, OutP)

    # VMEM budget: raise the conservative scoped default, stay under the physical
    # capacity of the current chip (64 MiB on v7x, 128 MiB on v5e/v6e).
    try:
        vmem_cap = int(pltpu.get_tpu_info().vmem_capacity_bytes)
    except Exception:
        vmem_cap = 64 * 1024 * 1024
    vmem_limit = int(min(100 * 1024 * 1024, int(0.9 * vmem_cap)))

    # Advisory cost estimate so XLA schedules the surrounding one-hot/pad/slice ops sensibly.
    flops = int(2 * EP * NP * (2 * FnP + DzP + 4)          # gathers, 4 seg-sum passes, scatter
                + 2 * EP * DzP * (TP + 3)                  # zphi + attention dots
                + 2 * NP * (DnP * FnP + DzP * OutP)        # fc_n + fc2
                + 2 * EP * DeP * FeP)                      # fc_e
    bytes_accessed = int(2 * EP * NP * 2 + EP * TP * 2     # bf16 one-hots (dominant)
                         + (NP * DnP + EP * DeP) * 4       # features
                         + (NP * OutP + EP * FeP) * 4)     # outputs
    cost = pl.CostEstimate(flops=flops, transcendentals=int(2 * EP + TP),
                           bytes_accessed=bytes_accessed)

    vmem = pl.BlockSpec(memory_space=pltpu.MemorySpace.VMEM)
    kernel = functools.partial(gat_layer_kernel, T, 0.01)   # F.leaky_relu default slope

    zf_p, ew_p = pl.pallas_call(
        kernel,
        out_shape=(jax.ShapeDtypeStruct((NP, OutP), f32),
                   jax.ShapeDtypeStruct((EP, FeP), f32)),
        in_specs=[vmem] * 18,
        out_specs=(vmem, vmem),
        compiler_params=pltpu.CompilerParams(vmem_limit_bytes=vmem_limit),
        cost_estimate=cost,
    )(h_p, e_p, S, Dm, et, WnT, WeT,
      w1eT, w1nT, w2aT, w2bT, w2cT, wsaT, wsbT, wscT, W2aT, W2bT, W2cT)

    # Outputs kept in f32 for module fidelity; could be bf16 if downstream tolerates it.
    return zf_p[:N, :out_dim], ew_p[:E, :Fe]


# ----------------------------------------------------------------------------
# Pure-JAX f32 reference (mirrors the PyTorch/DGL math) for a sanity check
# ----------------------------------------------------------------------------
def _seg_softmax_ref(scores, M):
    sc = jnp.where(M > 0, scores, -1e30)
    gmax = sc.max(axis=0, keepdims=True)
    emax = (M * gmax).sum(axis=1, keepdims=True)
    ex = jnp.exp(scores - emax)
    gsum = (M * ex).sum(axis=0, keepdims=True)
    esum = (M * gsum).sum(axis=1, keepdims=True)
    return ex / esum


def gat_layer_reference(h, e, src, dst, etype_idx, params, *, T):
    Wn, We, w1, w2, wsem, W2 = params
    N = h.shape[0]
    S = jax.nn.one_hot(src, N, dtype=jnp.float32)
    Dm = jax.nn.one_hot(dst, N, dtype=jnp.float32)
    et = jax.nn.one_hot(etype_idx, T, dtype=jnp.float32)

    z = h @ Wn.T
    ew0 = e @ We.T
    z_src = S @ z
    e1 = jax.nn.leaky_relu(jnp.concatenate([ew0, z_src], axis=1) @ w1.T, 0.01)
    gamma = _seg_softmax_ref(e1, S)
    ew = gamma * ew0

    z_dst = Dm @ z
    zcat = jnp.concatenate([z_src, ew, z_dst], axis=1)
    e2 = jax.nn.leaky_relu(zcat @ w2.T, 0.01)
    alpha = _seg_softmax_ref(e2, Dm)
    weighted = alpha * zcat
    h3 = jnp.einsum('en,et,ed->ntd', Dm, et, weighted)      # (N, T, Dz)

    zphi = h3.sum(axis=0)                                   # (T, Dz)
    wphi = jax.nn.leaky_relu(zphi @ wsem.T, 0.01)            # (T, 1)
    beta = jax.nn.softmax(wphi, axis=0)
    Z = jnp.sum(beta[None, :, :] * h3, axis=1)               # (N, Dz)
    zf = Z @ W2.T
    return zf, ew


# ----------------------------------------------------------------------------
if __name__ == "__main__":
    # Small shapes consistent with the module's forward
    N = 8            # nodes
    K = 4            # regular out-degree == in-degree
    E = N * K        # edges
    node_dim = 16
    edge_dim = 8
    node_ft_out_dim = 16      # Fn
    edge_ft_out_dim = 8       # Fe
    out_dim = 16
    T = 4                     # number of edge types
    Dz = node_ft_out_dim + edge_ft_out_dim + node_ft_out_dim

    # Deterministic regular graph: node i -> (i+1..i+K) mod N
    src = jnp.repeat(jnp.arange(N, dtype=jnp.int32), K)
    dst = (src + jnp.tile(jnp.arange(1, K + 1, dtype=jnp.int32), N)) % N
    etype_idx = (src + dst) % T

    key = jax.random.PRNGKey(0)
    ks = jax.random.split(key, 8)
    h = jax.random.normal(ks[0], (N, node_dim), dtype=jnp.float32)
    e = jax.random.normal(ks[1], (E, edge_dim), dtype=jnp.float32)

    # Deterministic "Linear" weights (shape (out, in), bias=False everywhere)
    Wn = 0.2 * jax.random.normal(ks[2], (node_ft_out_dim, node_dim), dtype=jnp.float32)
    We = 0.2 * jax.random.normal(ks[3], (edge_ft_out_dim, edge_dim), dtype=jnp.float32)
    w1 = 0.2 * jax.random.normal(ks[4], (1, node_ft_out_dim + edge_ft_out_dim), dtype=jnp.float32)
    w2 = 0.2 * jax.random.normal(ks[5], (1, Dz), dtype=jnp.float32)
    wsem = 0.2 * jax.random.normal(ks[6], (1, Dz), dtype=jnp.float32)
    W2 = 0.2 * jax.random.normal(ks[7], (out_dim, Dz), dtype=jnp.float32)
    params = (Wn, We, w1, w2, wsem, W2)

    zf, ew = gat_layer_forward(h, e, src, dst, etype_idx, params, T=T, out_dim=out_dim)
    jax.block_until_ready((zf, ew))

    zf_ref, ew_ref = gat_layer_reference(h, e, src, dst, etype_idx, params, T=T)
    # bf16 MXU operands + approximate reciprocal -> compare at a slightly relaxed tolerance.
    ok = (zf.shape == (N, out_dim) and ew.shape == (E, edge_ft_out_dim)
          and bool(jnp.all(jnp.isfinite(zf))) and bool(jnp.all(jnp.isfinite(ew)))
          and bool(jnp.allclose(zf, zf_ref, rtol=2e-2, atol=2e-2))
          and bool(jnp.allclose(ew, ew_ref, rtol=2e-2, atol=2e-2)))
    if ok:
        print("KERNEL_OK")
    else:
        print("KERNEL_MISMATCH")
</pallas_src>

<mosaic_0001>
module attributes {stable_mosaic.version = 11 : i64} {
  func.func @gat_layer_kernel(%arg0: memref<128x128xf32, #tpu.memory_space<vmem>>, %arg1: memref<32x128xf32, #tpu.memory_space<vmem>>, %arg2: memref<32x128xbf16, #tpu.memory_space<vmem>>, %arg3: memref<32x128xbf16, #tpu.memory_space<vmem>>, %arg4: memref<32x8xbf16, #tpu.memory_space<vmem>>, %arg5: memref<128x128xf32, #tpu.memory_space<vmem>>, %arg6: memref<128x128xf32, #tpu.memory_space<vmem>>, %arg7: memref<128x1xf32, #tpu.memory_space<vmem>>, %arg8: memref<128x1xf32, #tpu.memory_space<vmem>>, %arg9: memref<128x1xf32, #tpu.memory_space<vmem>>, %arg10: memref<128x1xf32, #tpu.memory_space<vmem>>, %arg11: memref<128x1xf32, #tpu.memory_space<vmem>>, %arg12: memref<128x1xf32, #tpu.memory_space<vmem>>, %arg13: memref<128x1xf32, #tpu.memory_space<vmem>>, %arg14: memref<128x1xf32, #tpu.memory_space<vmem>>, %arg15: memref<128x128xf32, #tpu.memory_space<vmem>>, %arg16: memref<128x128xf32, #tpu.memory_space<vmem>>, %arg17: memref<128x128xf32, #tpu.memory_space<vmem>>, %arg18: memref<128x128xf32, #tpu.memory_space<vmem>>, %arg19: memref<32x128xf32, #tpu.memory_space<vmem>>) attributes {dimension_semantics = [], scalar_prefetch = 0 : i64, scratch_operands = 0 : i64, tpu.core_type = #tpu.core_type<tc>} {
    %c0 = arith.constant 0 : index
    %c0_0 = arith.constant 0 : index
    %0 = vector.load %arg2[%c0, %c0_0] : memref<32x128xbf16, #tpu.memory_space<vmem>>, vector<32x128xbf16>
    %c0_1 = arith.constant 0 : index
    %c0_2 = arith.constant 0 : index
    %1 = vector.load %arg3[%c0_1, %c0_2] : memref<32x128xbf16, #tpu.memory_space<vmem>>, vector<32x128xbf16>
    %c0_3 = arith.constant 0 : index
    %c0_4 = arith.constant 0 : index
    %2 = vector.load %arg4[%c0_3, %c0_4] : memref<32x8xbf16, #tpu.memory_space<vmem>>, vector<32x8xbf16>
    %c0_5 = arith.constant 0 : index
    %c0_6 = arith.constant 0 : index
    %3 = vector.load %arg0[%c0_5, %c0_6] : memref<128x128xf32, #tpu.memory_space<vmem>>, vector<128x128xf32>
    %c0_7 = arith.constant 0 : index
    %c0_8 = arith.constant 0 : index
    %4 = vector.load %arg5[%c0_7, %c0_8] : memref<128x128xf32, #tpu.memory_space<vmem>>, vector<128x128xf32>
    %cst = arith.constant dense<0.000000e+00> : vector<128x128xf32>
    %5 = tpu.matmul %3, %4, %cst {dimension_numbers = #tpu.dot_dimension_numbers<[1], [0], [0], [1], [0, 0, 1, 1], [], []>} : vector<128x128xf32>, vector<128x128xf32>, vector<128x128xf32> -> vector<128x128xf32>
    %c0_9 = arith.constant 0 : index
    %c0_10 = arith.constant 0 : index
    %6 = vector.load %arg1[%c0_9, %c0_10] : memref<32x128xf32, #tpu.memory_space<vmem>>, vector<32x128xf32>
    %c0_11 = arith.constant 0 : index
    %c0_12 = arith.constant 0 : index
    %7 = vector.load %arg6[%c0_11, %c0_12] : memref<128x128xf32, #tpu.memory_space<vmem>>, vector<128x128xf32>
    %cst_13 = arith.constant dense<0.000000e+00> : vector<32x128xf32>
    %8 = tpu.matmul %6, %7, %cst_13 {dimension_numbers = #tpu.dot_dimension_numbers<[1], [0], [0], [1], [0, 0, 1, 1], [], []>} : vector<32x128xf32>, vector<128x128xf32>, vector<32x128xf32> -> vector<32x128xf32>
    %9 = arith.truncf %5 : vector<128x128xf32> to vector<128x128xbf16>
    %cst_14 = arith.constant dense<0.000000e+00> : vector<32x128xf32>
    %10 = tpu.matmul %0, %9, %cst_14 {dimension_numbers = #tpu.dot_dimension_numbers<[1], [0], [0], [1], [0, 0, 1, 1], [], []>} : vector<32x128xbf16>, vector<128x128xbf16>, vector<32x128xf32> -> vector<32x128xf32>
    %cst_15 = arith.constant dense<0.000000e+00> : vector<32x128xf32>
    %11 = tpu.matmul %1, %9, %cst_15 {dimension_numbers = #tpu.dot_dimension_numbers<[1], [0], [0], [1], [0, 0, 1, 1], [], []>} : vector<32x128xbf16>, vector<128x128xbf16>, vector<32x128xf32> -> vector<32x128xf32>
    %c0_16 = arith.constant 0 : index
    %c0_17 = arith.constant 0 : index
    %12 = vector.load %arg7[%c0_16, %c0_17] : memref<128x1xf32, #tpu.memory_space<vmem>>, vector<128x1xf32>
    %cst_18 = arith.constant dense<0.000000e+00> : vector<32x1xf32>
    %13 = tpu.matmul %8, %12, %cst_18 {dimension_numbers = #tpu.dot_dimension_numbers<[1], [0], [0], [1], [0, 0, 1, 1], [], []>} : vector<32x128xf32>, vector<128x1xf32>, vector<32x1xf32> -> vector<32x1xf32>
    %c0_19 = arith.constant 0 : index
    %c0_20 = arith.constant 0 : index
    %14 = vector.load %arg8[%c0_19, %c0_20] : memref<128x1xf32, #tpu.memory_space<vmem>>, vector<128x1xf32>
    %cst_21 = arith.constant dense<0.000000e+00> : vector<32x1xf32>
    %15 = tpu.matmul %10, %14, %cst_21 {dimension_numbers = #tpu.dot_dimension_numbers<[1], [0], [0], [1], [0, 0, 1, 1], [], []>} : vector<32x128xf32>, vector<128x1xf32>, vector<32x1xf32> -> vector<32x1xf32>
    %16 = arith.addf %13, %15 : vector<32x1xf32>
    %cst_22 = arith.constant 0.000000e+00 : f32
    %17 = vector.broadcast %cst_22 : f32 to vector<32x1xf32>
    %18 = arith.cmpf oge, %16, %17 : vector<32x1xf32>
    %cst_23 = arith.constant 0.00999999977 : f32
    %19 = vector.broadcast %cst_23 : f32 to vector<32x1xf32>
    %20 = arith.mulf %19, %16 : vector<32x1xf32>
    %21 = arith.select %18, %16, %20 : vector<32x1xi1>, vector<32x1xf32>
    %cst_24 = arith.constant dense<0xFF800000> : vector<1xf32>
    %22 = vector.multi_reduction <maximumf>, %21, %cst_24 [0] : vector<32x1xf32> to vector<1xf32>
    %23 = vector.shape_cast %22 : vector<1xf32> to vector<1x1xf32>
    %24 = vector.broadcast %23 : vector<1x1xf32> to vector<32x1xf32>
    %25 = arith.subf %21, %24 : vector<32x1xf32>
    %26 = math.exp %25 : vector<32x1xf32>
    %27 = arith.truncf %26 : vector<32x1xf32> to vector<32x1xbf16>
    %cst_25 = arith.constant dense<0.000000e+00> : vector<128x1xf32>
    %28 = tpu.matmul %0, %27, %cst_25 {dimension_numbers = #tpu.dot_dimension_numbers<[0], [0], [1], [1], [0, 1, 1, 1], [], []>} : vector<32x128xbf16>, vector<32x1xbf16>, vector<128x1xf32> -> vector<128x1xf32>
    %29 = arith.truncf %28 : vector<128x1xf32> to vector<128x1xbf16>
    %cst_26 = arith.constant dense<0.000000e+00> : vector<32x1xf32>
    %30 = tpu.matmul %0, %29, %cst_26 {dimension_numbers = #tpu.dot_dimension_numbers<[1], [0], [0], [1], [0, 0, 1, 1], [], []>} : vector<32x128xbf16>, vector<128x1xbf16>, vector<32x1xf32> -> vector<32x1xf32>
    %cst_27 = arith.constant 9.99999996E-13 : f32
    %31 = vector.broadcast %cst_27 : f32 to vector<32x1xf32>
    %32 = arith.addf %30, %31 : vector<32x1xf32>
    %33 = tpu.reciprocal %32 {approx = true} : vector<32x1xf32> -> vector<32x1xf32>
    %34 = arith.mulf %26, %33 : vector<32x1xf32>
    %35 = vector.broadcast %34 : vector<32x1xf32> to vector<32x128xf32>
    %36 = arith.mulf %35, %8 : vector<32x128xf32>
    %c0_28 = arith.constant 0 : index
    %c0_29 = arith.constant 0 : index
    %37 = vector.load %arg19[%c0_28, %c0_29] : memref<32x128xf32, #tpu.memory_space<vmem>>, vector<32x128xf32>
    tpu.vector_store %arg19[%c0_28, %c0_29], %36 {strides = array<i32>} : memref<32x128xf32, #tpu.memory_space<vmem>>, vector<32x128xf32>,
    %c0_30 = arith.constant 0 : index
    %c0_31 = arith.constant 0 : index
    %38 = vector.load %arg9[%c0_30, %c0_31] : memref<128x1xf32, #tpu.memory_space<vmem>>, vector<128x1xf32>
    %cst_32 = arith.constant dense<0.000000e+00> : vector<32x1xf32>
    %39 = tpu.matmul %10, %38, %cst_32 {dimension_numbers = #tpu.dot_dimension_numbers<[1], [0], [0], [1], [0, 0, 1, 1], [], []>} : vector<32x128xf32>, vector<128x1xf32>, vector<32x1xf32> -> vector<32x1xf32>
    %c0_33 = arith.constant 0 : index
    %c0_34 = arith.constant 0 : index
    %40 = vector.load %arg10[%c0_33, %c0_34] : memref<128x1xf32, #tpu.memory_space<vmem>>, vector<128x1xf32>
    %cst_35 = arith.constant dense<0.000000e+00> : vector<32x1xf32>
    %41 = tpu.matmul %36, %40, %cst_35 {dimension_numbers = #tpu.dot_dimension_numbers<[1], [0], [0], [1], [0, 0, 1, 1], [], []>} : vector<32x128xf32>, vector<128x1xf32>, vector<32x1xf32> -> vector<32x1xf32>
    %42 = arith.addf %39, %41 : vector<32x1xf32>
    %c0_36 = arith.constant 0 : index
    %c0_37 = arith.constant 0 : index
    %43 = vector.load %arg11[%c0_36, %c0_37] : memref<128x1xf32, #tpu.memory_space<vmem>>, vector<128x1xf32>
    %cst_38 = arith.constant dense<0.000000e+00> : vector<32x1xf32>
    %44 = tpu.matmul %11, %43, %cst_38 {dimension_numbers = #tpu.dot_dimension_numbers<[1], [0], [0], [1], [0, 0, 1, 1], [], []>} : vector<32x128xf32>, vector<128x1xf32>, vector<32x1xf32> -> vector<32x1xf32>
    %45 = arith.addf %42, %44 : vector<32x1xf32>
    %cst_39 = arith.constant 0.000000e+00 : f32
    %46 = vector.broadcast %cst_39 : f32 to vector<32x1xf32>
    %47 = arith.cmpf oge, %45, %46 : vector<32x1xf32>
    %cst_40 = arith.constant 0.00999999977 : f32
    %48 = vector.broadcast %cst_40 : f32 to vector<32x1xf32>
    %49 = arith.mulf %48, %45 : vector<32x1xf32>
    %50 = arith.select %47, %45, %49 : vector<32x1xi1>, vector<32x1xf32>
    %cst_41 = arith.constant dense<0xFF800000> : vector<1xf32>
    %51 = vector.multi_reduction <maximumf>, %50, %cst_41 [0] : vector<32x1xf32> to vector<1xf32>
    %52 = vector.shape_cast %51 : vector<1xf32> to vector<1x1xf32>
    %53 = vector.broadcast %52 : vector<1x1xf32> to vector<32x1xf32>
    %54 = arith.subf %50, %53 : vector<32x1xf32>
    %55 = math.exp %54 : vector<32x1xf32>
    %56 = arith.truncf %55 : vector<32x1xf32> to vector<32x1xbf16>
    %cst_42 = arith.constant dense<0.000000e+00> : vector<128x1xf32>
    %57 = tpu.matmul %1, %56, %cst_42 {dimension_numbers = #tpu.dot_dimension_numbers<[0], [0], [1], [1], [0, 1, 1, 1], [], []>} : vector<32x128xbf16>, vector<32x1xbf16>, vector<128x1xf32> -> vector<128x1xf32>
    %58 = arith.truncf %57 : vector<128x1xf32> to vector<128x1xbf16>
    %cst_43 = arith.constant dense<0.000000e+00> : vector<32x1xf32>
    %59 = tpu.matmul %1, %58, %cst_43 {dimension_numbers = #tpu.dot_dimension_numbers<[1], [0], [0], [1], [0, 0, 1, 1], [], []>} : vector<32x128xbf16>, vector<128x1xbf16>, vector<32x1xf32> -> vector<32x1xf32>
    %cst_44 = arith.constant 9.99999996E-13 : f32
    %60 = vector.broadcast %cst_44 : f32 to vector<32x1xf32>
    %61 = arith.addf %59, %60 : vector<32x1xf32>
    %62 = tpu.reciprocal %61 {approx = true} : vector<32x1xf32> -> vector<32x1xf32>
    %63 = arith.mulf %55, %62 : vector<32x1xf32>
    %64 = vector.broadcast %63 : vector<32x1xf32> to vector<32x128xf32>
    %65 = arith.mulf %64, %10 : vector<32x128xf32>
    %66 = arith.truncf %65 : vector<32x128xf32> to vector<32x128xbf16>
    %67 = vector.broadcast %63 : vector<32x1xf32> to vector<32x128xf32>
    %68 = arith.mulf %67, %36 : vector<32x128xf32>
    %69 = arith.truncf %68 : vector<32x128xf32> to vector<32x128xbf16>
    %70 = vector.broadcast %63 : vector<32x1xf32> to vector<32x128xf32>
    %71 = arith.mulf %70, %11 : vector<32x128xf32>
    %72 = arith.truncf %71 : vector<32x128xf32> to vector<32x128xbf16>
    %cst_45 = arith.constant dense<0.000000e+00> : vector<8x128xf32>
    %73 = tpu.matmul %2, %66, %cst_45 {dimension_numbers = #tpu.dot_dimension_numbers<[0], [0], [1], [1], [0, 1, 1, 1], [], []>} : vector<32x8xbf16>, vector<32x128xbf16>, vector<8x128xf32> -> vector<8x128xf32>
    %cst_46 = arith.constant dense<0.000000e+00> : vector<8x128xf32>
    %74 = tpu.matmul %2, %69, %cst_46 {dimension_numbers = #tpu.dot_dimension_numbers<[0], [0], [1], [1], [0, 1, 1, 1], [], []>} : vector<32x8xbf16>, vector<32x128xbf16>, vector<8x128xf32> -> vector<8x128xf32>
    %cst_47 = arith.constant dense<0.000000e+00> : vector<8x128xf32>
    %75 = tpu.matmul %2, %72, %cst_47 {dimension_numbers = #tpu.dot_dimension_numbers<[0], [0], [1], [1], [0, 1, 1, 1], [], []>} : vector<32x8xbf16>, vector<32x128xbf16>, vector<8x128xf32> -> vector<8x128xf32>
    %c0_48 = arith.constant 0 : index
    %c0_49 = arith.constant 0 : index
    %76 = vector.load %arg12[%c0_48, %c0_49] : memref<128x1xf32, #tpu.memory_space<vmem>>, vector<128x1xf32>
    %cst_50 = arith.constant dense<0.000000e+00> : vector<8x1xf32>
    %77 = tpu.matmul %73, %76, %cst_50 {dimension_numbers = #tpu.dot_dimension_numbers<[1], [0], [0], [1], [0, 0, 1, 1], [], []>} : vector<8x128xf32>, vector<128x1xf32>, vector<8x1xf32> -> vector<8x1xf32>
    %c0_51 = arith.constant 0 : index
    %c0_52 = arith.constant 0 : index
    %78 = vector.load %arg13[%c0_51, %c0_52] : memref<128x1xf32, #tpu.memory_space<vmem>>, vector<128x1xf32>
    %cst_53 = arith.constant dense<0.000000e+00> : vector<8x1xf32>
    %79 = tpu.matmul %74, %78, %cst_53 {dimension_numbers = #tpu.dot_dimension_numbers<[1], [0], [0], [1], [0, 0, 1, 1], [], []>} : vector<8x128xf32>, vector<128x1xf32>, vector<8x1xf32> -> vector<8x1xf32>
    %80 = arith.addf %77, %79 : vector<8x1xf32>
    %c0_54 = arith.constant 0 : index
    %c0_55 = arith.constant 0 : index
    %81 = vector.load %arg14[%c0_54, %c0_55] : memref<128x1xf32, #tpu.memory_space<vmem>>, vector<128x1xf32>
    %cst_56 = arith.constant dense<0.000000e+00> : vector<8x1xf32>
    %82 = tpu.matmul %75, %81, %cst_56 {dimension_numbers = #tpu.dot_dimension_numbers<[1], [0], [0], [1], [0, 0, 1, 1], [], []>} : vector<8x128xf32>, vector<128x1xf32>, vector<8x1xf32> -> vector<8x1xf32>
    %83 = arith.addf %80, %82 : vector<8x1xf32>
    %cst_57 = arith.constant 0.000000e+00 : f32
    %84 = vector.broadcast %cst_57 : f32 to vector<8x1xf32>
    %85 = arith.cmpf oge, %83, %84 : vector<8x1xf32>
    %cst_58 = arith.constant 0.00999999977 : f32
    %86 = vector.broadcast %cst_58 : f32 to vector<8x1xf32>
    %87 = arith.mulf %86, %83 : vector<8x1xf32>
    %88 = arith.select %85, %83, %87 : vector<8x1xi1>, vector<8x1xf32>
    %89 = tpu.iota {dimensions = array<i32: 0>} : vector<8x1xi32>
    %c4_i32 = arith.constant 4 : i32
    %90 = vector.broadcast %c4_i32 : i32 to vector<8x1xi32>
    %91 = arith.cmpi slt, %89, %90 : vector<8x1xi32>
    %cst_59 = arith.constant -1.000000e+30 : f32
    %92 = vector.broadcast %cst_59 : f32 to vector<8x1xf32>
    %93 = arith.select %91, %88, %92 : vector<8x1xi1>, vector<8x1xf32>
    %cst_60 = arith.constant dense<0xFF800000> : vector<1xf32>
    %94 = vector.multi_reduction <maximumf>, %93, %cst_60 [0] : vector<8x1xf32> to vector<1xf32>
    %95 = vector.shape_cast %94 : vector<1xf32> to vector<1x1xf32>
    %96 = vector.broadcast %95 : vector<1x1xf32> to vector<8x1xf32>
    %97 = arith.subf %93, %96 : vector<8x1xf32>
    %98 = math.exp %97 : vector<8x1xf32>
    %cst_61 = arith.constant 0.000000e+00 : f32
    %99 = vector.broadcast %cst_61 : f32 to vector<8x1xf32>
    %100 = arith.select %91, %98, %99 : vector<8x1xi1>, vector<8x1xf32>
    %cst_62 = arith.constant dense<0.000000e+00> : vector<1xf32>
    %101 = vector.multi_reduction <add>, %100, %cst_62 [0] : vector<8x1xf32> to vector<1xf32>
    %102 = vector.shape_cast %101 : vector<1xf32> to vector<1x1xf32>
    %103 = tpu.reciprocal %102 {approx = true} : vector<1x1xf32> -> vector<1x1xf32>
    %104 = vector.broadcast %103 : vector<1x1xf32> to vector<8x1xf32>
    %105 = arith.mulf %100, %104 : vector<8x1xf32>
    %106 = arith.extf %2 : vector<32x8xbf16> to vector<32x8xf32>
    %cst_63 = arith.constant dense<0.000000e+00> : vector<32x1xf32>
    %107 = tpu.matmul %106, %105, %cst_63 {dimension_numbers = #tpu.dot_dimension_numbers<[1], [0], [0], [1], [0, 0, 1, 1], [], []>} : vector<32x8xf32>, vector<8x1xf32>, vector<32x1xf32> -> vector<32x1xf32>
    %108 = arith.mulf %63, %107 : vector<32x1xf32>
    %109 = vector.broadcast %108 : vector<32x1xf32> to vector<32x128xf32>
    %110 = arith.mulf %109, %10 : vector<32x128xf32>
    %111 = arith.truncf %110 : vector<32x128xf32> to vector<32x128xbf16>
    %cst_64 = arith.constant dense<0.000000e+00> : vector<128x128xf32>
    %112 = tpu.matmul %1, %111, %cst_64 {dimension_numbers = #tpu.dot_dimension_numbers<[0], [0], [1], [1], [0, 1, 1, 1], [], []>} : vector<32x128xbf16>, vector<32x128xbf16>, vector<128x128xf32> -> vector<128x128xf32>
    %113 = vector.broadcast %108 : vector<32x1xf32> to vector<32x128xf32>
    %114 = arith.mulf %113, %36 : vector<32x128xf32>
    %115 = arith.truncf %114 : vector<32x128xf32> to vector<32x128xbf16>
    %cst_65 = arith.constant dense<0.000000e+00> : vector<128x128xf32>
    %116 = tpu.matmul %1, %115, %cst_65 {dimension_numbers = #tpu.dot_dimension_numbers<[0], [0], [1], [1], [0, 1, 1, 1], [], []>} : vector<32x128xbf16>, vector<32x128xbf16>, vector<128x128xf32> -> vector<128x128xf32>
    %117 = vector.broadcast %108 : vector<32x1xf32> to vector<32x128xf32>
    %118 = arith.mulf %117, %11 : vector<32x128xf32>
    %119 = arith.truncf %118 : vector<32x128xf32> to vector<32x128xbf16>
    %cst_66 = arith.constant dense<0.000000e+00> : vector<128x128xf32>
    %120 = tpu.matmul %1, %119, %cst_66 {dimension_numbers = #tpu.dot_dimension_numbers<[0], [0], [1], [1], [0, 1, 1, 1], [], []>} : vector<32x128xbf16>, vector<32x128xbf16>, vector<128x128xf32> -> vector<128x128xf32>
    %c0_67 = arith.constant 0 : index
    %c0_68 = arith.constant 0 : index
    %121 = vector.load %arg15[%c0_67, %c0_68] : memref<128x128xf32, #tpu.memory_space<vmem>>, vector<128x128xf32>
    %cst_69 = arith.constant dense<0.000000e+00> : vector<128x128xf32>
    %122 = tpu.matmul %112, %121, %cst_69 {dimension_numbers = #tpu.dot_dimension_numbers<[1], [0], [0], [1], [0, 0, 1, 1], [], []>} : vector<128x128xf32>, vector<128x128xf32>, vector<128x128xf32> -> vector<128x128xf32>
    %c0_70 = arith.constant 0 : index
    %c0_71 = arith.constant 0 : index
    %123 = vector.load %arg16[%c0_70, %c0_71] : memref<128x128xf32, #tpu.memory_space<vmem>>, vector<128x128xf32>
    %cst_72 = arith.constant dense<0.000000e+00> : vector<128x128xf32>
    %124 = tpu.matmul %116, %123, %cst_72 {dimension_numbers = #tpu.dot_dimension_numbers<[1], [0], [0], [1], [0, 0, 1, 1], [], []>} : vector<128x128xf32>, vector<128x128xf32>, vector<128x128xf32> -> vector<128x128xf32>
    %125 = arith.addf %122, %124 : vector<128x128xf32>
    %c0_73 = arith.constant 0 : index
    %c0_74 = arith.constant 0 : index
    %126 = vector.load %arg17[%c0_73, %c0_74] : memref<128x128xf32, #tpu.memory_space<vmem>>, vector<128x128xf32>
    %cst_75 = arith.constant dense<0.000000e+00> : vector<128x128xf32>
    %127 = tpu.matmul %120, %126, %cst_75 {dimension_numbers = #tpu.dot_dimension_numbers<[1], [0], [0], [1], [0, 0, 1, 1], [], []>} : vector<128x128xf32>, vector<128x128xf32>, vector<128x128xf32> -> vector<128x128xf32>
    %128 = arith.addf %125, %127 : vector<128x128xf32>
    %c0_76 = arith.constant 0 : index
    %c0_77 = arith.constant 0 : index
    %129 = vector.load %arg18[%c0_76, %c0_77] : memref<128x128xf32, #tpu.memory_space<vmem>>, vector<128x128xf32>
    tpu.vector_store %arg18[%c0_76, %c0_77], %128 {strides = array<i32>} : memref<128x128xf32, #tpu.memory_space<vmem>>, vector<128x128xf32>,
    return
  }
}

</mosaic_0001>

<bundles_post_ra>
// kernel: tpu_custom_call.1
= control target key start
LH: loop header
LB: loop body
LE: loop exit
PB: predicated region body
PF: predicated region fallthrough
CT: control target
= control target key end

     0   :  { %s2945_s0 = inlined_call_operand.vmem [shape: f32[128,128], index: 0, kind: input, shape index: {}]   ;;  %s2946_s1 = inlined_call_operand.vmem [shape: f32[32,128], index: 1, kind: input, shape index: {}]   ;;  %s2947_s2 = inlined_call_operand.vmem [shape: bf16[32,128], index: 2, kind: input, shape index: {}]   ;;  %s2948_s3 = inlined_call_operand.vmem [shape: bf16[32,128], index: 3, kind: input, shape index: {}]   ;;  %s2949_s4 = inlined_call_operand.vmem [shape: bf16[32,8], index: 4, kind: input, shape index: {}]   ;;  %s2950_s5 = inlined_call_operand.vmem [shape: f32[128,128], index: 5, kind: input, shape index: {}]   ;;  %s2951_s6 = inlined_call_operand.vmem [shape: f32[128,128], index: 6, kind: input, shape index: {}]   ;;  %s2952_s7 = inlined_call_operand.vmem [shape: f32[128,1], index: 7, kind: input, shape index: {}]   ;;  %s2953_s8 = inlined_call_operand.vmem [shape: f32[128,1], index: 8, kind: input, shape index: {}]   ;;  %s2954_s9 = inlined_call_operand.vmem [shape: f32[128,1], index: 9, kind: input, shape index: {}]   ;;  %s2955_s10 = inlined_call_operand.vmem [shape: f32[128,1], index: 10, kind: input, shape index: {}]   ;;  %s2956_s11 = inlined_call_operand.vmem [shape: f32[128,1], index: 11, kind: input, shape index: {}]   ;;  %s2957_s12 = inlined_call_operand.vmem [shape: f32[128,1], index: 12, kind: input, shape index: {}]   ;;  %s2958_s13 = inlined_call_operand.vmem [shape: f32[128,1], index: 13, kind: input, shape index: {}]   ;;  %s2959_s14 = inlined_call_operand.vmem [shape: f32[128,1], index: 14, kind: input, shape index: {}]   ;;  %s2960_s15 = inlined_call_operand.vmem [shape: f32[128,128], index: 15, kind: input, shape index: {}]   ;;  %s2961_s16 = inlined_call_operand.vmem [shape: f32[128,128], index: 16, kind: input, shape index: {}]   ;;  %s2962_s17 = inlined_call_operand.vmem [shape: f32[128,128], index: 17, kind: input, shape index: {}]   ;;  %s2963_s18 = inlined_call_operand.hbm [shape: f32[128,128], index: 18, kind: output, shape index: {0}]   ;;  %s2964_s19 = inlined_call_operand.hbm [shape: f32[32,128], index: 19, kind: output, shape index: {1}]  }
   0x1   :  { %2969 = sst [smem:[#allocation8_spill]] %s2945_s0 }
   0x2   :  { %2970 = sst [smem:[#allocation9_spill]] %s2946_s1 }
   0x3   :  { %2971 = sst [smem:[#allocation10_spill]] %s2947_s2 }
   0x4   :  { %2972 = sst [smem:[#allocation11_spill]] %s2948_s3 }
   0x5   :  { %25 = vsyncpa [#allocation3], 0  ;;  %v107_v0 = vld [vmem:[%s2950_s5 + $0x78] sm:$0xff]  ;;  %v106_v1 = vld [vmem:[%s2950_s5 + $0x70] sm:$0xff] }
   0x6   :  { %108 = vmatpush.msra.mxu0 %v107_v0  ;;  %v105_v2 = vld [vmem:[%s2950_s5 + $0x68] sm:$0xff]  ;;  %v104_v3 = vld [vmem:[%s2950_s5 + $0x60] sm:$0xff]  ;;  %v103_v4 = vld [vmem:[%s2950_s5 + $0x58] sm:$0xff] }
   0x8   :  { %109 = vmatpush.msra.mxu0 %v106_v1 }
   0xa   :  { %110 = vmatpush.msra.mxu0 %v105_v2 }
   0xb   :  { %26 = vsyncpa [#allocation5], 0  ;;  %v102_v5 = vld [vmem:[%s2950_s5 + $0x50] sm:$0xff]  ;;  %v101_v6 = vld [vmem:[%s2950_s5 + $0x48] sm:$0xff]  ;;  %s2973_s1 = sld [smem:[#allocation8_spill]]  ;;  %vm394_vm3 = vcmask 7168  }
   0xc   :  { %111 = vmatpush.msra.mxu0 %v104_v3  ;;  %v100_v7 = vld [vmem:[%s2950_s5 + $0x40] sm:$0xff]  ;;  %v99_v8 = vld [vmem:[%s2950_s5 + $0x38] sm:$0xff]  ;;  %v98_v9 = vld [vmem:[%s2950_s5 + $0x30] sm:$0xff]  ;;  %s2974_s2 = sld [smem:[#allocation9_spill]]  ;;  %vm438_vm5 = vcmask 261120   ;;  %vm1125_vm12 = vcmask 64512  }
   0xd   :  { %v97_v10 = vld [vmem:[%s2950_s5 + $0x28] sm:$0xff]  ;;  %v96_v11 = vld [vmem:[%s2950_s5 + $0x20] sm:$0xff]  ;;  %v95_v12 = vld [vmem:[%s2950_s5 + $0x18] sm:$0xff]  ;;  %s2975_s25 = sld [smem:[#allocation10_spill]]  ;;  %s1650_s29 = sshll.u32 %s2964_s19, 4  ;;  %s1651_s29 = int_to_ptr.hbm [resolvable:$true] %s1650_s29 }
   0xe   :  { %112 = vmatpush.msra.mxu0 %v103_v4  ;;  %v94_v13 = vld [vmem:[%s2950_s5 + $0x10] sm:$0xff]  ;;  %v93_v14 = vld [vmem:[%s2950_s5 + $0x8] sm:$0xff]  ;;  %v92_v15 = vld [vmem:[%s2950_s5] sm:$0xff]  ;;  %s2976_s27 = sld [smem:[#allocation11_spill]]  ;;  %s1844_s0 = smov 128  }
   0xf   :  { %v192_v44 = vld [vmem:[%s2951_s6 + $0x78] sm:$0xff]  ;;  %v191_v45 = vld [vmem:[%s2951_s6 + $0x70] sm:$0xff]  ;;  %v190_v46 = vld [vmem:[%s2951_s6 + $0x68] sm:$0xff]  ;;  %s1845_s30 = smov 8   ;;  %s1846_s19 = smov [#allocation2]  }
  0x10   :  { %113 = vmatpush.msra.mxu0 %v102_v5  ;;  %193 = vmatpush.msra.mxu1 %v192_v44  ;;  %v189_v47 = vld [vmem:[%s2951_s6 + $0x60] sm:$0xff]  ;;  %v188_v48 = vld [vmem:[%s2951_s6 + $0x58] sm:$0xff]  ;;  %v187_v50 = vld [vmem:[%s2951_s6 + $0x50] sm:$0xff]  ;;  %s1635_s20 = sshll.u32 %s1846_s19, 4  ;;  %s1636_s20 = int_to_ptr.vmem [resolvable:$true] %s1635_s20 }
  0x11   :  { %v76_v16 = vld [vmem:[%s2973_s1] sm:$0xff]  ;;  %v77_v17 = vld [vmem:[%s2973_s1 + $0x8] sm:$0xff]  ;;  %v78_v18 = vld [vmem:[%s2973_s1 + $0x10] sm:$0xff] }
  0x12   :  { %114 = vmatpush.msra.mxu0 %v101_v6  ;;  %v79_v19 = vld [vmem:[%s2973_s1 + $0x18] sm:$0xff]  ;;  %v80_v20 = vld [vmem:[%s2973_s1 + $0x20] sm:$0xff]  ;;  %v81_v21 = vld [vmem:[%s2973_s1 + $0x28] sm:$0xff]  ;;  %194 = vmatpush.msra.mxu1 %v191_v45 }
  0x13   :  { %v82_v22 = vld [vmem:[%s2973_s1 + $0x30] sm:$0xff]  ;;  %v83_v23 = vld [vmem:[%s2973_s1 + $0x38] sm:$0xff]  ;;  %v84_v24 = vld [vmem:[%s2973_s1 + $0x40] sm:$0xff] }
  0x14   :  { %115 = vmatpush.msra.mxu0 %v100_v7  ;;  %v85_v25 = vld [vmem:[%s2973_s1 + $0x48] sm:$0xff]  ;;  %v86_v26 = vld [vmem:[%s2973_s1 + $0x50] sm:$0xff]  ;;  %v87_v27 = vld [vmem:[%s2973_s1 + $0x58] sm:$0xff]  ;;  %195 = vmatpush.msra.mxu1 %v190_v46 }
  0x15   :  { %v88_v28 = vld [vmem:[%s2973_s1 + $0x60] sm:$0xff]  ;;  %v89_v29 = vld [vmem:[%s2973_s1 + $0x68] sm:$0xff]  ;;  %v90_v30 = vld [vmem:[%s2973_s1 + $0x70] sm:$0xff] }
  0x16   :  { %116 = vmatpush.msra.mxu0 %v99_v8  ;;  %v91_v31 = vld [vmem:[%s2973_s1 + $0x78] sm:$0xff]  ;;  %196 = vmatpush.msra.mxu1 %v189_v47  ;;  %v186_v51 = vld [vmem:[%s2951_s6 + $0x48] sm:$0xff]  ;;  %v185_v52 = vld [vmem:[%s2951_s6 + $0x40] sm:$0xff]  ;;  %s1637_s1 = sshll.u32 %s2963_s18, 4  ;;  %s1638_s1 = int_to_ptr.hbm [resolvable:$true] %s1637_s1 }
  0x17   :  { %v184_v53 = vld [vmem:[%s2951_s6 + $0x38] sm:$0xff]  ;;  %v183_v55 = vld [vmem:[%s2951_s6 + $0x30] sm:$0xff]  ;;  %v182_v56 = vld [vmem:[%s2951_s6 + $0x28] sm:$0xff] }
  0x18   :  { %117 = vmatpush.msra.mxu0 %v98_v9  ;;  %197 = vmatpush.msra.mxu1 %v188_v48  ;;  %v181_v57 = vld [vmem:[%s2951_s6 + $0x20] sm:$0xff]  ;;  %v180_v58 = vld [vmem:[%s2951_s6 + $0x18] sm:$0xff]  ;;  %v179_v60 = vld [vmem:[%s2951_s6 + $0x10] sm:$0xff] }
  0x19   :  { %v178_v61 = vld [vmem:[%s2951_s6 + $0x8] sm:$0xff]  ;;  %v177_v63 = vld [vmem:[%s2951_s6] sm:$0xff]  ;;  %v175_v7 = vld [vmem:[%s2974_s2 + $0x10] sm:$0xff] }
  0x1a   :  { %118 = vmatpush.msra.mxu0 %v97_v10  ;;  %198 = vmatpush.msra.mxu1 %v187_v50  ;;  %v173_v0 = vld [vmem:[%s2974_s2] sm:$0xff]  ;;  %v174_v4 = vld [vmem:[%s2974_s2 + $0x8] sm:$0xff] }
  0x1b   :  { %v2109_v1 = vld [vmem:[%s2975_s25] sm:$0xff]  ;;  %v2121_v8 = vld [vmem:[%s2975_s25 + $0x8] sm:$0xff] }
  0x1c   :  { %119 = vmatpush.msra.mxu0 %v96_v11  ;;  %199 = vmatpush.msra.mxu1 %v186_v51  ;;  %v176_v11 = vld [vmem:[%s2974_s2 + $0x18] sm:$0xff]  ;;  %v309_v44 = vld [vmem:[%s2953_s8 + $0x8] sm:$0xff]  ;;  %v308_v46 = vld [vmem:[%s2953_s8] sm:$0xff] }
  0x1d   :  { %422 = vxpose.xlu0.c.b16.start [1/2] (short) %v2109_v1, 128 }
  0x1e   :  { %120 = vmatpush.msra.mxu0 %v95_v12  ;;  %200 = vmatpush.msra.mxu1 %v185_v52 }
  0x20   :  { %121 = vmatpush.msra.mxu0 %v94_v13  ;;  %201 = vmatpush.msra.mxu1 %v184_v53  ;;  %v307_v13 = vld [vmem:[%s2952_s7 + $0x78] sm:$0xff] }
  0x21   :  { %353 = vmatpush.msra.mxu2 %v307_v13 }
  0x22   :  { %122 = vmatpush.msra.mxu0 %v93_v14  ;;  %202 = vmatpush.msra.mxu1 %v183_v55  ;;  %v306_v14 = vld [vmem:[%s2952_s7 + $0x70] sm:$0xff]  ;;  %v2262_v55 = vld [vmem:[%s2976_s27] sm:$0xff] }
  0x23   :  { %354 = vmatpush.msra.mxu2 %v306_v14 }
  0x24   :  { %123 = vmatpush.msra.mxu0 %v92_v15  ;;  %203 = vmatpush.msra.mxu1 %v182_v56 }
  0x25   :  { %124 = vmatmul.f32.vlgmr.msra.gmra.mxu0 %v76_v16  ;;  %v323_v16 = vld [vmem:[%s2953_s8 + $0x78] sm:$0xff] }
  0x26   :  { %204 = vmatpush.msra.mxu1 %v181_v57 }
  0x28   :  { %205 = vmatpush.msra.mxu1 %v180_v58 }
  0x2a   :  { %206 = vmatpush.msra.mxu1 %v179_v60 }
  0x2c   :  { %207 = vmatpush.msra.mxu1 %v178_v61 }
  0x2d   :  { %127 = vmatmul.f32.gmra.mxu0 %v77_v17  ;;  %423 = vxpose.xlu0.c.b16.end [2/2] (short) %v2121_v8, 128  ;;  %v322_v17 = vld [vmem:[%s2953_s8 + $0x70] sm:$0xff] }
  0x2e   :  { %208 = vmatpush.msra.mxu1 %v177_v63 }
  0x2f   :  { %209 = vmatmul.f32.vlgmr.msra.gmra.mxu1 %v173_v0 }
  0x30   :  { %324 = vmatpush.msrb.mxu1 %v323_v16 }
  0x32   :  { %325 = vmatpush.msrb.mxu1 %v322_v17 }
  0x35   :  { %130 = vmatmul.f32.gmra.mxu0 %v78_v18  ;;  %v305_v18 = vld [vmem:[%s2952_s7 + $0x68] sm:$0xff] }
  0x36   :  { %355 = vmatpush.msra.mxu2 %v305_v18 }
  0x37   :  { %212 = vmatmul.f32.gmra.mxu1 %v174_v4 }
  0x3d   :  { %133 = vmatmul.f32.gmra.mxu0 %v79_v19  ;;  %v321_v19 = vld [vmem:[%s2953_s8 + $0x68] sm:$0xff] }
  0x3e   :  { %326 = vmatpush.msrb.mxu1 %v321_v19 }
  0x3f   :  { %215 = vmatmul.f32.gmra.mxu1 %v175_v7 }
  0x45   :  { %136 = vmatmul.f32.gmra.mxu0 %v80_v20  ;;  %v304_v20 = vld [vmem:[%s2952_s7 + $0x60] sm:$0xff] }
  0x46   :  { %356 = vmatpush.msra.mxu2 %v304_v20 }
  0x47   :  { %218 = vmatmul.f32.gmra.mxu1 %v176_v11 }
  0x4d   :  { %139 = vmatmul.f32.gmra.mxu0 %v81_v21  ;;  %v320_v21 = vld [vmem:[%s2953_s8 + $0x60] sm:$0xff] }
  0x4e   :  { %327 = vmatpush.msrb.mxu1 %v320_v21 }
  0x55   :  { %142 = vmatmul.f32.gmra.mxu0 %v82_v22  ;;  %v303_v22 = vld [vmem:[%s2952_s7 + $0x58] sm:$0xff] }
  0x56   :  { %357 = vmatpush.msra.mxu2 %v303_v22 }
  0x5d   :  { %145 = vmatmul.f32.gmra.mxu0 %v83_v23  ;;  %v319_v23 = vld [vmem:[%s2953_s8 + $0x58] sm:$0xff] }
  0x5e   :  { %328 = vmatpush.msrb.mxu1 %v319_v23 }
  0x65   :  { %148 = vmatmul.f32.gmra.mxu0 %v84_v24  ;;  %v302_v24 = vld [vmem:[%s2952_s7 + $0x50] sm:$0xff] }
  0x66   :  { %358 = vmatpush.msra.mxu2 %v302_v24 }
  0x6d   :  { %151 = vmatmul.f32.gmra.mxu0 %v85_v25  ;;  %v318_v25 = vld [vmem:[%s2953_s8 + $0x50] sm:$0xff] }
  0x6e   :  { %329 = vmatpush.msrb.mxu1 %v318_v25 }
  0x75   :  { %154 = vmatmul.f32.gmra.mxu0 %v86_v26  ;;  %v301_v26 = vld [vmem:[%s2952_s7 + $0x48] sm:$0xff] }
  0x76   :  { %359 = vmatpush.msra.mxu2 %v301_v26 }
  0x7d   :  { %157 = vmatmul.f32.gmra.mxu0 %v87_v27  ;;  %v317_v27 = vld [vmem:[%s2953_s8 + $0x48] sm:$0xff] }
  0x7e   :  { %330 = vmatpush.msrb.mxu1 %v317_v27 }
  0x85   :  { %160 = vmatmul.f32.gmra.mxu0 %v88_v28  ;;  %v300_v28 = vld [vmem:[%s2952_s7 + $0x40] sm:$0xff] }
  0x86   :  { %360 = vmatpush.msra.mxu2 %v300_v28 }
  0x8d   :  { %163 = vmatmul.f32.gmra.mxu0 %v89_v29  ;;  %v316_v29 = vld [vmem:[%s2953_s8 + $0x40] sm:$0xff] }
  0x8e   :  { %331 = vmatpush.msrb.mxu1 %v316_v29 }
  0x95   :  { %166 = vmatmul.f32.gmra.mxu0 %v90_v30  ;;  %v299_v30 = vld [vmem:[%s2952_s7 + $0x38] sm:$0xff] }
  0x96   :  { %361 = vmatpush.msra.mxu2 %v299_v30 }
  0x9d   :  { %169 = vmatmul.f32.gmra.mxu0 %v91_v31  ;;  %v315_v31 = vld [vmem:[%s2953_s8 + $0x38] sm:$0xff] }
  0x9e   :  { %332 = vmatpush.msrb.mxu1 %v315_v31 }
  0xa2   :  { %v2043_v32 = vpop.f32.mrf.mxu0 }
  0xaa   :  { %v2045_v33 = vpop.f32.mrf.mxu0 }
  0xab   :  { %v222_v15 = vpack.c.bf16 %v2045_v33, %v2043_v32  ;;  %v298_v32 = vld [vmem:[%s2952_s7 + $0x30] sm:$0xff] }
  0xac   :  { %v314_v33 = vld [vmem:[%s2953_s8 + $0x30] sm:$0xff]  ;;  %362 = vmatpush.msra.mxu2 %v298_v32  ;;  %v2232_v45 = vpop.f32.mrf.mxu1 }
  0xad   :  { %333 = vmatpush.msrb.mxu1 %v314_v33 }
  0xb2   :  { %v2047_v34 = vpop.f32.mrf.mxu0 }
  0xb4   :  { %v2238_v47 = vpop.f32.mrf.mxu1 }
  0xba   :  { %v2049_v35 = vpop.f32.mrf.mxu0 }
  0xbb   :  { %v2131_v12 = vpack.c.bf16 %v2049_v35, %v2047_v34  ;;  %v297_v34 = vld [vmem:[%s2952_s7 + $0x28] sm:$0xff] }
  0xbc   :  { %v313_v35 = vld [vmem:[%s2953_s8 + $0x28] sm:$0xff]  ;;  %363 = vmatpush.msra.mxu2 %v297_v34  ;;  %v2241_v48 = vpop.f32.mrf.mxu1 }
  0xbd   :  { %334 = vmatpush.msrb.mxu1 %v313_v35 }
  0xc2   :  { %v2051_v36 = vpop.f32.mrf.mxu0 }
  0xca   :  { %v2053_v37 = vpop.f32.mrf.mxu0 }
  0xcb   :  { %v224_v10 = vpack.c.bf16 %v2053_v37, %v2051_v36  ;;  %v296_v36 = vld [vmem:[%s2952_s7 + $0x20] sm:$0xff] }
  0xcc   :  { %v312_v37 = vld [vmem:[%s2953_s8 + $0x20] sm:$0xff]  ;;  %364 = vmatpush.msra.mxu2 %v296_v36 }
  0xcd   :  { %335 = vmatpush.msrb.mxu1 %v312_v37 }
  0xd2   :  { %v143_v38 = vpop.f32.mrf.mxu0 }
  0xda   :  { %v146_v39 = vpop.f32.mrf.mxu0 }
  0xdb   :  { %v225_v9 = vpack.c.bf16 %v146_v39, %v143_v38  ;;  %v295_v38 = vld [vmem:[%s2952_s7 + $0x18] sm:$0xff]  ;;  %v294_v39 = vld [vmem:[%s2952_s7 + $0x10] sm:$0xff] }
  0xdc   :  { %365 = vmatpush.msra.mxu2 %v295_v38 }
  0xde   :  { %366 = vmatpush.msra.mxu2 %v294_v39 }
  0xe2   :  { %v149_v40 = vpop.f32.mrf.mxu0 }
  0xea   :  { %v152_v41 = vpop.f32.mrf.mxu0 }
  0xeb   :  { %v226_v6 = vpack.c.bf16 %v152_v41, %v149_v40  ;;  %v293_v40 = vld [vmem:[%s2952_s7 + $0x8] sm:$0xff]  ;;  %v311_v41 = vld [vmem:[%s2953_s8 + $0x18] sm:$0xff] }
  0xec   :  { %367 = vmatpush.msra.mxu2 %v293_v40  ;;  %336 = vmatpush.msrb.mxu1 %v311_v41  ;;  %v430_v41 = vpop.trf.xlu0 }
  0xf2   :  { %v155_v42 = vpop.f32.mrf.mxu0 }
  0xfa   :  { %v158_v43 = vpop.f32.mrf.mxu0 }
  0xfb   :  { %v227_v5 = vpack.c.bf16 %v158_v43, %v155_v42  ;;  %v292_v42 = vld [vmem:[%s2952_s7] sm:$0xff]  ;;  %v310_v43 = vld [vmem:[%s2953_s8 + $0x10] sm:$0xff] }
  0xfc   :  { %368 = vmatpush.msra.mxu2 %v292_v42  ;;  %337 = vmatpush.msrb.mxu1 %v310_v43  ;;  %v431_v42 = vpop.trf.xlu0 }
  0xfd   :  { %369 = vmatmul.f32.vlgmr.msra.gmra.mxu2 %v2232_v45 }
  0xfe   :  { %338 = vmatpush.msrb.mxu1 %v309_v44 }
 0x100   :  { %339 = vmatpush.msrb.mxu1 %v308_v46 }
 0x102   :  { %v161_v49 = vpop.f32.mrf.mxu0 }
 0x104   :  { %v432_v43 = vpop.trf.xlu0 }
 0x105   :  { %372 = vmatmul.f32.gmra.mxu2 %v2238_v47 }
 0x10a   :  { %v164_v54 = vpop.f32.mrf.mxu0 }
 0x10b   :  { %v228_v3 = vpack.c.bf16 %v164_v54, %v161_v49  ;;  %v2244_v49 = vpop.f32.mrf.mxu1 }
 0x10c   :  { %v433_v44 = vpop.trf.xlu0 }
 0x10d   :  { %375 = vmatmul.f32.gmra.mxu2 %v2241_v48 }
 0x112   :  { %v167_v59 = vpop.f32.mrf.mxu0 }
 0x114   :  { %v434_v46 = vpop.trf.xlu0 }
 0x115   :  { %378 = vmatmul.f32.gmra.mxu2 %v2244_v49 }
 0x11a   :  { %v170_v62 = vpop.f32.mrf.mxu0 }
 0x11b   :  { %v229_v2 = vpack.c.bf16 %v170_v62, %v167_v59  ;;  %v2268_v59 = vld [vmem:[%s2976_s27 + $0x8] sm:$0xff] }
 0x11d   :  { %242 = vmatpush.bf16.msra.mxu3 %v229_v2 }
 0x121   :  { %243 = vmatpush.bf16.msra.mxu3 %v228_v3 }
 0x125   :  { %244 = vmatpush.bf16.msra.mxu3 %v227_v5 }
 0x129   :  { %245 = vmatpush.bf16.msra.mxu3 %v226_v6 }
 0x12d   :  { %246 = vmatpush.bf16.msra.mxu3 %v225_v9 }
 0x131   :  { %247 = vmatpush.bf16.msra.mxu3 %v224_v10 }
 0x135   :  { %248 = vmatpush.bf16.msra.mxu3 %v2131_v12 }
 0x139   :  { %249 = vmatpush.bf16.msra.mxu3 %v222_v15 }
 0x13c   :  { %250 = vmatmul.bf16.vlgmr.msra.gmra.mxu3 %v2109_v1 }
 0x13d   :  { %273 = vmatpush.bf16.msrb.mxu3 %v229_v2 }
 0x141   :  { %274 = vmatpush.bf16.msrb.mxu3 %v228_v3 }
 0x145   :  { %275 = vmatpush.bf16.msrb.mxu3 %v227_v5 }
 0x149   :  { %276 = vmatpush.bf16.msrb.mxu3 %v226_v6 }
 0x14c   :  { %255 = vmatmul.bf16.gmra.mxu3 %v2121_v8 }
 0x14d   :  { %277 = vmatpush.bf16.msrb.mxu3 %v225_v9 }
 0x151   :  { %278 = vmatpush.bf16.msrb.mxu3 %v224_v10 }
 0x155   :  { %279 = vmatpush.bf16.msrb.mxu3 %v2131_v12 }
 0x159   :  { %280 = vmatpush.bf16.msrb.mxu3 %v222_v15 }
 0x15c   :  { %281 = vmatmul.bf16.vlgmr.msrb.gmra.mxu3 %v2262_v55 }
 0x16c   :  { %286 = vmatmul.bf16.gmra.mxu3 %v2268_v59 }
 0x180   :  { %v370_v54 = vpop.f32.mrf.mxu2 }
 0x188   :  { %v373_v57 = vpop.f32.mrf.mxu2 }
 0x190   :  { %v376_v60 = vpop.f32.mrf.mxu2 }
 0x198   :  { %v379_v3 = vpop.f32.mrf.mxu2 }
 0x1bf   :  { %v2247_v50 = vpop.f32.mrf.mxu3 }
 0x1c0   :  { %340 = vmatmul.f32.vlgmr.msrb.gmra.mxu1 %v2247_v50 }
 0x1c7   :  { %v2250_v51 = vpop.f32.mrf.mxu3 }
 0x1c8   :  { %343 = vmatmul.f32.gmra.mxu1 %v2250_v51 }
 0x1cf   :  { %v2253_v52 = vpop.f32.mrf.mxu3 }
 0x1d0   :  { %346 = vmatmul.f32.gmra.mxu1 %v2253_v52 }
 0x1d7   :  { %v2256_v53 = vpop.f32.mrf.mxu3 }
 0x1d8   :  { %349 = vmatmul.f32.gmra.mxu1 %v2256_v53 }
 0x23d   :  { %v341_v56 = vpop.f32.mrf.mxu1 }
 0x23e   :  { %v371_v63 = vadd.f32 %v370_v54, %v341_v56  ;;  %v435_v54 = vpop.trf.xlu0  ;;  %v2293_v56 = vpop.f32.mrf.mxu3 }
 0x240   :  { %v386_v4 = vmul.f32 0.01, %v371_v63  ;;  %vm382_vm1 = vcmp.ge.f32.partialorder %v371_v63, 0.0 }
 0x242   :  { %v390_v10 = vsel %vm382_vm1, %v371_v63, %v386_v4 }
 0x243   :  { %v395_v15 = vsel %vm394_vm3, %v390_v10, -inf }
 0x245   :  { %v344_v58 = vpop.f32.mrf.mxu1 }
 0x246   :  { %v374_v62 = vadd.f32 %v373_v57, %v344_v58  ;;  %v436_v57 = vpop.trf.xlu0  ;;  %v2296_v58 = vpop.f32.mrf.mxu3 }
 0x248   :  { %v387_v2 = vmul.f32 0.01, %v374_v62  ;;  %vm383_vm0 = vcmp.ge.f32.partialorder %v374_v62, 0.0 }
 0x24a   :  { %v391_v7 = vsel %vm383_vm0, %v374_v62, %v387_v2 }
 0x24b   :  { %v396_v13 = vsel %vm394_vm3, %v391_v7, -inf }
 0x24c   :  { %v399_v18 = vmax.f32 %v395_v15, %v396_v13 }
 0x24d   :  { %v347_v61 = vpop.f32.mrf.mxu1 }
 0x24e   :  { %v377_v0 = vadd.f32 %v376_v60, %v347_v61  ;;  %v437_v60 = vpop.trf.xlu0  ;;  %v2299_v61 = vpop.f32.mrf.mxu3 }
 0x250   :  { %v388_v5 = vmul.f32 0.01, %v377_v0  ;;  %vm384_vm2 = vcmp.ge.f32.partialorder %v377_v0, 0.0 }
 0x252   :  { %v392_v11 = vsel %vm384_vm2, %v377_v0, %v388_v5 }
 0x253   :  { %v397_v16 = vsel %vm394_vm3, %v392_v11, -inf }
 0x255   :  { %v350_v6 = vpop.f32.mrf.mxu1 }
 0x256   :  { %v380_v9 = vadd.f32 %v379_v3, %v350_v6  ;;  %v2301_v62 = vpop.f32.mrf.mxu3 }
 0x258   :  { %vm385_vm4 = vcmp.ge.f32.partialorder %v380_v9, 0.0  ;;  %v389_v12 = vmul.f32 0.01, %v380_v9 }
 0x25a   :  { %v393_v14 = vsel %vm385_vm4, %v380_v9, %v389_v12 }
 0x25b   :  { %v398_v17 = vsel %vm394_vm3, %v393_v14, -inf }
 0x25c   :  { %v400_v19 = vmax.f32 %v397_v16, %v398_v17 }
 0x25e   :  { %v401_v20 = vmax.f32 %v399_v18, %v400_v19 }
 0x260   :  { %v402_v21 = vrot.slane %v401_v20, 4 }
 0x262   :  { %v403_v22 = vmax.f32 %v401_v20, %v402_v21 }
 0x264   :  { %v404_v23 = vrot.slane %v403_v22, 2 }
 0x266   :  { %v405_v24 = vmax.f32 %v403_v22, %v404_v23 }
 0x268   :  { %v406_v25 = vrot.slane %v405_v24, 1 }
 0x26a   :  { %v407_v26 = vmax.f32 %v405_v24, %v406_v25  ;;  %v590_v25 = vld [vmem:[%s2954_s9 + $0x78] sm:$0xff] }
 0x26c   :  { %v411_v27 = vsub.f32 %v393_v14, %v407_v26  ;;  %v410_v28 = vsub.f32 %v392_v11, %v407_v26  ;;  %v408_v29 = vsub.f32 %v390_v10, %v407_v26  ;;  %v409_v30 = vsub.f32 %v391_v7, %v407_v26  ;;  %v589_v26 = vld [vmem:[%s2954_s9 + $0x70] sm:$0xff] }
 0x26e   :  { %v418_v31 = vmul.f32 1.442695, %v411_v27  ;;  %v416_v32 = vmul.f32 1.442695, %v410_v28  ;;  %v412_v33 = vmul.f32 1.442695, %v408_v29 }
 0x26f   :  { %v414_v34 = vmul.f32 1.442695, %v409_v30  ;;  %v588_v27 = vld [vmem:[%s2954_s9 + $0x68] sm:$0xff]  ;;  %v587_v28 = vld [vmem:[%s2954_s9 + $0x60] sm:$0xff]  ;;  %v586_v29 = vld [vmem:[%s2954_s9 + $0x58] sm:$0xff] }
 0x270   :  { %1754 = vpow2.f32 %v418_v31  ;;  %v585_v30 = vld [vmem:[%s2954_s9 + $0x50] sm:$0xff]  ;;  %v583_v31 = vld [vmem:[%s2954_s9 + $0x40] sm:$0xff] }
 0x271   :  { %1756 = vpow2.f32 %v416_v32  ;;  %v582_v32 = vld [vmem:[%s2954_s9 + $0x38] sm:$0xff] }
 0x272   :  { %1758 = vpow2.f32 %v412_v33  ;;  %v581_v33 = vld [vmem:[%s2954_s9 + $0x30] sm:$0xff] }
 0x273   :  { %1760 = vpow2.f32 %v414_v34  ;;  %v580_v34 = vld [vmem:[%s2954_s9 + $0x28] sm:$0xff] }
 0x276   :  { %v2275_v35 = vpop.eup %1754 }
 0x277   :  { %v2277_v36 = vpop.eup %1756 }
 0x278   :  { %v2279_v37 = vpop.eup %1758  ;;  %v421_v38 = vpack.c.bf16 %v2275_v35, %v2277_v36 }
 0x279   :  { %v2283_v39 = vpop.eup %1760 }
 0x27a   :  { %469 = vmatpush.bf16.msra.mxu3 %v421_v38  ;;  %v420_v40 = vpack.c.bf16 %v2283_v39, %v2279_v37  ;;  %v579_v38 = vld [vmem:[%s2954_s9 + $0x20] sm:$0xff] }
 0x27e   :  { %470 = vmatpush.bf16.msra.mxu3 %v420_v40  ;;  %v578_v40 = vld [vmem:[%s2954_s9 + $0x18] sm:$0xff] }
 0x281   :  { %1683 = vmatmul.msk.bf16.vlgmr.msra.gmra.mxu3 %vm438_vm5, %v430_v41  ;;  %v577_v41 = vld [vmem:[%s2954_s9 + $0x10] sm:$0xff] }
 0x291   :  { %1684 = vmatmul.msk.bf16.gmra.mxu3 %vm438_vm5, %v431_v42  ;;  %v575_v42 = vld [vmem:[%s2954_s9] sm:$0xff] }
 0x2a1   :  { %1685 = vmatmul.msk.bf16.gmra.mxu3 %vm438_vm5, %v432_v43  ;;  %v1842_v43 = vmov 0  }
 0x2a2   :  { %1751 = vset.pattern.permute.xlu1 %v1842_v43  ;;  %1752 = vset.pattern.permute.xlu2 %v1842_v43 }
 0x2a3   :  { %1753 = vset.pattern.permute.xlu0 %v1842_v43 }
 0x2b1   :  { %1686 = vmatmul.msk.bf16.gmra.mxu3 %vm438_vm5, %v433_v44 }
 0x2c1   :  { %1687 = vmatmul.msk.bf16.gmra.mxu3 %vm438_vm5, %v434_v46 }
 0x2d1   :  { %1688 = vmatmul.msk.bf16.gmra.mxu3 %vm438_vm5, %v435_v54 }
 0x2e1   :  { %1689 = vmatmul.msk.bf16.gmra.mxu3 %vm438_vm5, %v436_v57 }
 0x2f1   :  { %1690 = vmatmul.msk.bf16.gmra.mxu3 %vm438_vm5, %v437_v60 }
 0x304   :  { %v472_v63 = vpop.f32.mrf.mxu3 }
 0x30c   :  { %v474_v0 = vpop.f32.mrf.mxu3 }
 0x30d   :  { %v512_v24 = vpack.c.bf16 %v474_v0, %v472_v63 }
 0x314   :  { %v477_v2 = vpop.f32.mrf.mxu3 }
 0x31c   :  { %v479_v3 = vpop.f32.mrf.mxu3 }
 0x31d   :  { %v513_v23 = vpack.c.bf16 %v479_v3, %v477_v2 }
 0x324   :  { %v482_v4 = vpop.f32.mrf.mxu3 }
 0x32c   :  { %v484_v5 = vpop.f32.mrf.mxu3 }
 0x32d   :  { %v514_v22 = vpack.c.bf16 %v484_v5, %v482_v4 }
 0x334   :  { %v487_v6 = vpop.f32.mrf.mxu3 }
 0x33c   :  { %v489_v7 = vpop.f32.mrf.mxu3 }
 0x33d   :  { %v515_v21 = vpack.c.bf16 %v489_v7, %v487_v6  ;;  %v606_v6 = vld [vmem:[%s2955_s10 + $0x78] sm:$0xff]  ;;  %v605_v7 = vld [vmem:[%s2955_s10 + $0x70] sm:$0xff] }
 0x33e   :  { %607 = vmatpush.msrb.mxu2 %v606_v6 }
 0x340   :  { %608 = vmatpush.msrb.mxu2 %v605_v7 }
 0x344   :  { %v492_v9 = vpop.f32.mrf.mxu3 }
 0x34c   :  { %v494_v10 = vpop.f32.mrf.mxu3 }
 0x34d   :  { %v516_v20 = vpack.c.bf16 %v494_v10, %v492_v9 }
 0x354   :  { %v497_v11 = vpop.f32.mrf.mxu3 }
 0x35c   :  { %v499_v12 = vpop.f32.mrf.mxu3 }
 0x35d   :  { %v517_v19 = vpack.c.bf16 %v499_v12, %v497_v11  ;;  %v603_v11 = vld [vmem:[%s2955_s10 + $0x60] sm:$0xff]  ;;  %v602_v12 = vld [vmem:[%s2955_s10 + $0x58] sm:$0xff] }
 0x364   :  { %v502_v13 = vpop.f32.mrf.mxu3 }
 0x36c   :  { %v504_v14 = vpop.f32.mrf.mxu3 }
 0x36d   :  { %v518_v18 = vpack.c.bf16 %v504_v14, %v502_v13 }
 0x374   :  { %v507_v15 = vpop.f32.mrf.mxu3 }
 0x37c   :  { %v509_v16 = vpop.f32.mrf.mxu3 }
 0x37d   :  { %v519_v17 = vpack.c.bf16 %v509_v16, %v507_v15  ;;  %v600_v15 = vld [vmem:[%s2955_s10 + $0x48] sm:$0xff]  ;;  %v599_v16 = vld [vmem:[%s2955_s10 + $0x40] sm:$0xff] }
 0x37f   :  { %520 = vmatpush.bf16.msra.mxu1 %v519_v17  ;;  %v598_v17 = vld [vmem:[%s2955_s10 + $0x38] sm:$0xff] }
 0x383   :  { %521 = vmatpush.bf16.msra.mxu1 %v518_v18  ;;  %v596_v18 = vld [vmem:[%s2955_s10 + $0x28] sm:$0xff] }
 0x387   :  { %522 = vmatpush.bf16.msra.mxu1 %v517_v19  ;;  %v595_v19 = vld [vmem:[%s2955_s10 + $0x20] sm:$0xff] }
 0x38b   :  { %523 = vmatpush.bf16.msra.mxu1 %v516_v20  ;;  %v594_v20 = vld [vmem:[%s2955_s10 + $0x18] sm:$0xff] }
 0x38f   :  { %524 = vmatpush.bf16.msra.mxu1 %v515_v21  ;;  %v593_v21 = vld [vmem:[%s2955_s10 + $0x10] sm:$0xff] }
 0x393   :  { %525 = vmatpush.bf16.msra.mxu1 %v514_v22  ;;  %v592_v22 = vld [vmem:[%s2955_s10 + $0x8] sm:$0xff] }
 0x397   :  { %526 = vmatpush.bf16.msra.mxu1 %v513_v23  ;;  %v591_v23 = vld [vmem:[%s2955_s10] sm:$0xff] }
 0x39b   :  { %527 = vmatpush.bf16.msra.mxu1 %v512_v24  ;;  %v680_v24 = vld [vmem:[%s2956_s11 + $0x78] sm:$0xff] }
 0x39e   :  { %528 = vmatmul.bf16.vlgmr.msra.gmra.mxu1 %v2109_v1  ;;  %v584_v1 = vld [vmem:[%s2954_s9 + $0x48] sm:$0xff] }
 0x39f   :  { %636 = vmatpush.msrb.mxu1 %v590_v25  ;;  %v679_v25 = vld [vmem:[%s2956_s11 + $0x70] sm:$0xff] }
 0x3a1   :  { %637 = vmatpush.msrb.mxu1 %v589_v26  ;;  %v678_v26 = vld [vmem:[%s2956_s11 + $0x68] sm:$0xff] }
 0x3a3   :  { %638 = vmatpush.msrb.mxu1 %v588_v27  ;;  %v677_v27 = vld [vmem:[%s2956_s11 + $0x60] sm:$0xff] }
 0x3a5   :  { %639 = vmatpush.msrb.mxu1 %v587_v28  ;;  %v676_v28 = vld [vmem:[%s2956_s11 + $0x58] sm:$0xff] }
 0x3a7   :  { %640 = vmatpush.msrb.mxu1 %v586_v29  ;;  %v675_v29 = vld [vmem:[%s2956_s11 + $0x50] sm:$0xff] }
 0x3a9   :  { %641 = vmatpush.msrb.mxu1 %v585_v30  ;;  %v674_v30 = vld [vmem:[%s2956_s11 + $0x48] sm:$0xff] }
 0x3ab   :  { %642 = vmatpush.msrb.mxu1 %v584_v1  ;;  %v673_v1 = vld [vmem:[%s2956_s11 + $0x40] sm:$0xff] }
 0x3ad   :  { %643 = vmatpush.msrb.mxu1 %v583_v31  ;;  %v672_v31 = vld [vmem:[%s2956_s11 + $0x38] sm:$0xff] }
 0x3ae   :  { %533 = vmatmul.bf16.gmra.mxu1 %v2121_v8  ;;  %v576_v8 = vld [vmem:[%s2954_s9 + $0x8] sm:$0xff] }
 0x3af   :  { %644 = vmatpush.msrb.mxu1 %v582_v32  ;;  %v671_v32 = vld [vmem:[%s2956_s11 + $0x30] sm:$0xff] }
 0x3b1   :  { %645 = vmatpush.msrb.mxu1 %v581_v33  ;;  %v670_v33 = vld [vmem:[%s2956_s11 + $0x28] sm:$0xff] }
 0x3b3   :  { %646 = vmatpush.msrb.mxu1 %v580_v34 }
 0x3b5   :  { %647 = vmatpush.msrb.mxu1 %v579_v38 }
 0x3b7   :  { %648 = vmatpush.msrb.mxu1 %v578_v40  ;;  %v669_v40 = vld [vmem:[%s2956_s11 + $0x20] sm:$0xff] }
 0x3b9   :  { %649 = vmatpush.msrb.mxu1 %v577_v41  ;;  %v668_v41 = vld [vmem:[%s2956_s11 + $0x18] sm:$0xff] }
 0x3bb   :  { %650 = vmatpush.msrb.mxu1 %v576_v8  ;;  %v667_v8 = vld [vmem:[%s2956_s11 + $0x10] sm:$0xff] }
 0x3bd   :  { %651 = vmatpush.msrb.mxu1 %v575_v42 }
 0x3be   :  { %652 = vmatmul.f32.vlgmr.msrb.gmra.mxu1 %v2247_v50 }
 0x3c6   :  { %655 = vmatmul.f32.gmra.mxu1 %v2250_v51 }
 0x3ce   :  { %658 = vmatmul.f32.gmra.mxu1 %v2253_v52 }
 0x3d6   :  { %661 = vmatmul.f32.gmra.mxu1 %v2256_v53 }
 0x41b   :  { %v529_v44 = vpop.f32.mrf.mxu1 }
 0x41c   :  { %v530_v46 = vadd.f32 1e-12, %v529_v44 }
 0x41e   :  { %1762 = vrcp.f32 %v530_v46 }
 0x423   :  { %v531_v54 = vpop.f32.mrf.mxu1 }
 0x424   :  { %v1763_v57 = vpop.eup %1762  ;;  %v532_v60 = vadd.f32 1e-12, %v531_v54  ;;  %v665_v54 = vld [vmem:[%s2956_s11] sm:$0xff] }
 0x425   :  { %v543_v63 = vmul.f32 %v1763_v57, %v2279_v37 }
 0x426   :  { %1764 = vrcp.f32 %v532_v60 }
 0x427   :  { %549 = vperm.xlu1 %1751, %v543_v63  }
 0x42b   :  { %v534_v0 = vpop.f32.mrf.mxu1 }
 0x42c   :  { %v1765_v2 = vpop.eup %1764  ;;  %v535_v3 = vadd.f32 1e-12, %v534_v0 }
 0x42d   :  { %v544_v4 = vmul.f32 %v1765_v2, %v2283_v39  ;;  %v604_v39 = vld [vmem:[%s2955_s10 + $0x68] sm:$0xff] }
 0x42e   :  { %1766 = vrcp.f32 %v535_v3  ;;  %609 = vmatpush.msrb.mxu2 %v604_v39 }
 0x42f   :  { %554 = vperm.xlu1 %1751, %v544_v4  }
 0x430   :  { %610 = vmatpush.msrb.mxu2 %v603_v11 }
 0x432   :  { %611 = vmatpush.msrb.mxu2 %v602_v12 }
 0x433   :  { %v536_v5 = vpop.f32.mrf.mxu1 }
 0x434   :  { %v1767_v9 = vpop.eup %1766  ;;  %v537_v37 = vadd.f32 1e-12, %v536_v5 }
 0x435   :  { %v545_v10 = vmul.f32 %v1767_v9, %v2277_v36  ;;  %v601_v36 = vld [vmem:[%s2955_s10 + $0x50] sm:$0xff] }
 0x436   :  { %1768 = vrcp.f32 %v537_v37  ;;  %612 = vmatpush.msrb.mxu2 %v601_v36 }
 0x437   :  { %559 = vperm.xlu2 %1752, %v545_v10  }
 0x438   :  { %613 = vmatpush.msrb.mxu2 %v600_v15 }
 0x43a   :  { %614 = vmatpush.msrb.mxu2 %v599_v16 }
 0x43b   :  { %v653_v63 = vpop.f32.mrf.mxu1 }
 0x43c   :  { %v1769_v13 = vpop.eup %1768  ;;  %615 = vmatpush.msrb.mxu2 %v598_v17 }
 0x43d   :  { %v546_v14 = vmul.f32 %v1769_v13, %v2275_v35  ;;  %v597_v35 = vld [vmem:[%s2955_s10 + $0x30] sm:$0xff] }
 0x43e   :  { %616 = vmatpush.msrb.mxu2 %v597_v35 }
 0x43f   :  { %564 = vperm.xlu2 %1752, %v546_v14  }
 0x440   :  { %617 = vmatpush.msrb.mxu2 %v596_v18 }
 0x442   :  { %618 = vmatpush.msrb.mxu2 %v595_v19 }
 0x443   :  { %v656_v3 = vpop.f32.mrf.mxu1 }
 0x444   :  { %619 = vmatpush.msrb.mxu2 %v594_v20 }
 0x446   :  { %620 = vmatpush.msrb.mxu2 %v593_v21 }
 0x448   :  { %621 = vmatpush.msrb.mxu2 %v592_v22 }
 0x44a   :  { %622 = vmatpush.msrb.mxu2 %v591_v23 }
 0x44b   :  { %v659_v5 = vpop.f32.mrf.mxu1 }
 0x44c   :  { %681 = vmatpush.msra.mxu2 %v680_v24 }
 0x44e   :  { %682 = vmatpush.msra.mxu2 %v679_v25 }
 0x450   :  { %683 = vmatpush.msra.mxu2 %v678_v26 }
 0x452   :  { %684 = vmatpush.msra.mxu2 %v677_v27 }
 0x453   :  { %v662_v36 = vpop.f32.mrf.mxu1 }
 0x454   :  { %685 = vmatpush.msra.mxu2 %v676_v28 }
 0x456   :  { %686 = vmatpush.msra.mxu2 %v675_v29 }
 0x458   :  { %687 = vmatpush.msra.mxu2 %v674_v30 }
 0x45a   :  { %688 = vmatpush.msra.mxu2 %v673_v1 }
 0x45c   :  { %689 = vmatpush.msra.mxu2 %v672_v31 }
 0x45e   :  { %690 = vmatpush.msra.mxu2 %v671_v32 }
 0x460   :  { %691 = vmatpush.msra.mxu2 %v670_v33 }
 0x462   :  { %692 = vmatpush.msra.mxu2 %v669_v40 }
 0x464   :  { %753 = vxpose.xlu1.c.b16.start [1/2] (short) %v2262_v55, 128  ;;  %693 = vmatpush.msra.mxu2 %v668_v41 }
 0x466   :  { %694 = vmatpush.msra.mxu2 %v667_v8 }
 0x474   :  { %754 = vxpose.xlu1.c.b16.end [2/2] (short) %v2268_v59, 128 }
 0x491   :  { %v560_v34 = vpop.permute.xlu2 %559 }
 0x492   :  { %v2445_v38 = vmul.f32 %v560_v34, %v2241_v48  ;;  %v666_v48 = vld [vmem:[%s2956_s11 + $0x8] sm:$0xff] }
 0x493   :  { %695 = vmatpush.msra.mxu2 %v666_v48 }
 0x494   :  { %573 = vst [vmem:[#allocation4 + $0x10] sm:$0xff] %v2445_v38 }
 0x495   :  { %696 = vmatpush.msra.mxu2 %v665_v54 }
 0x499   :  { %v565_v42 = vpop.permute.xlu2 %564  ;;  %v550_v43 = vpop.permute.xlu1 %549 }
 0x49a   :  { %v2461_v44 = vmul.f32 %v565_v42, %v2244_v49  ;;  %v2464_v46 = vmul.f32 %v550_v43, %v2232_v45 }
 0x49c   :  { %574 = vst [vmem:[#allocation4 + $0x18] sm:$0xff] %v2461_v44  ;;  %623 = vmatmul.f32.vlgmr.msrb.gmra.mxu2 %v2464_v46 }
 0x49d   :  { %571 = vst [vmem:[#allocation4] sm:$0xff] %v2464_v46 }
 0x4a1   :  { %v555_v57 = vpop.permute.xlu1 %554 }
 0x4a2   :  { %v2473_v60 = vmul.f32 %v555_v57, %v2238_v47 }
 0x4a4   :  { %572 = vst [vmem:[#allocation4 + $0x8] sm:$0xff] %v2473_v60  ;;  %626 = vmatmul.f32.gmra.mxu2 %v2473_v60 }
 0x4ac   :  { %629 = vmatmul.f32.gmra.mxu2 %v2445_v38 }
 0x4b4   :  { %632 = vmatmul.f32.gmra.mxu2 %v2461_v44 }
 0x4bc   :  { %697 = vmatmul.f32.vlgmr.msra.gmra.mxu2 %v2293_v56 }
 0x4c4   :  { %700 = vmatmul.f32.gmra.mxu2 %v2296_v58 }
 0x4cc   :  { %703 = vmatmul.f32.gmra.mxu2 %v2299_v61 }
 0x4d4   :  { %706 = vmatmul.f32.gmra.mxu2 %v2301_v62 }
 0x51f   :  { %v624_v45 = vpop.f32.mrf.mxu2 }
 0x520   :  { %v654_v9 = vadd.f32 %v653_v63, %v624_v45 }
 0x527   :  { %v627_v49 = vpop.f32.mrf.mxu2 }
 0x528   :  { %v657_v6 = vadd.f32 %v656_v3, %v627_v49 }
 0x52f   :  { %v630_v47 = vpop.f32.mrf.mxu2 }
 0x530   :  { %v660_v37 = vadd.f32 %v659_v5, %v630_v47 }
 0x537   :  { %v633_v0 = vpop.f32.mrf.mxu2 }
 0x538   :  { %v663_v13 = vadd.f32 %v662_v36, %v633_v0 }
 0x53f   :  { %v698_v2 = vpop.f32.mrf.mxu2 }
 0x540   :  { %v710_v39 = vadd.f32 %v698_v2, %v654_v9  ;;  %v2499_v2 = vpop.trf.xlu1 }
 0x542   :  { %v718_v14 = vmul.f32 0.01, %v710_v39  ;;  %vm714_vm7 = vcmp.ge.f32.partialorder %v710_v39, 0.0 }
 0x544   :  { %v722_v18 = vsel %vm714_vm7, %v710_v39, %v718_v14 }
 0x545   :  { %v726_v23 = vsel %vm394_vm3, %v722_v18, -inf }
 0x547   :  { %v701_v4 = vpop.f32.mrf.mxu2 }
 0x548   :  { %v711_v10 = vadd.f32 %v701_v4, %v657_v6  ;;  %v2503_v3 = vpop.trf.xlu1 }
 0x54a   :  { %v719_v12 = vmul.f32 0.01, %v711_v10  ;;  %vm715_vm6 = vcmp.ge.f32.partialorder %v711_v10, 0.0 }
 0x54c   :  { %v723_v17 = vsel %vm715_vm6, %v711_v10, %v719_v12 }
 0x54d   :  { %v727_v21 = vsel %vm394_vm3, %v723_v17, -inf }
 0x54e   :  { %v730_v26 = vmax.f32 %v726_v23, %v727_v21 }
 0x54f   :  { %v704_v7 = vpop.f32.mrf.mxu2 }
 0x550   :  { %v712_v11 = vadd.f32 %v704_v7, %v660_v37  ;;  %v2507_v4 = vpop.trf.xlu1 }
 0x552   :  { %v720_v15 = vmul.f32 0.01, %v712_v11  ;;  %vm716_vm8 = vcmp.ge.f32.partialorder %v712_v11, 0.0 }
 0x554   :  { %v724_v19 = vsel %vm716_vm8, %v712_v11, %v720_v15 }
 0x555   :  { %v728_v24 = vsel %vm394_vm3, %v724_v19, -inf }
 0x557   :  { %v707_v16 = vpop.f32.mrf.mxu2 }
 0x558   :  { %v713_v35 = vadd.f32 %v707_v16, %v663_v13  ;;  %v2511_v5 = vpop.trf.xlu1 }
 0x55a   :  { %vm717_vm9 = vcmp.ge.f32.partialorder %v713_v35, 0.0  ;;  %v721_v20 = vmul.f32 0.01, %v713_v35 }
 0x55c   :  { %v725_v22 = vsel %vm717_vm9, %v713_v35, %v721_v20 }
 0x55d   :  { %v729_v25 = vsel %vm394_vm3, %v725_v22, -inf }
 0x55e   :  { %v731_v27 = vmax.f32 %v728_v24, %v729_v25 }
 0x560   :  { %v732_v28 = vmax.f32 %v730_v26, %v731_v27  ;;  %v2515_v6 = vpop.trf.xlu1 }
 0x562   :  { %v733_v29 = vrot.slane %v732_v28, 4 }
 0x564   :  { %v734_v30 = vmax.f32 %v732_v28, %v733_v29 }
 0x566   :  { %v735_v1 = vrot.slane %v734_v30, 2 }
 0x568   :  { %v736_v31 = vmax.f32 %v734_v30, %v735_v1  ;;  %v2519_v7 = vpop.trf.xlu1 }
 0x56a   :  { %v737_v32 = vrot.slane %v736_v31, 1 }
 0x56c   :  { %v738_v33 = vmax.f32 %v736_v31, %v737_v32 }
 0x56e   :  { %v742_v34 = vsub.f32 %v725_v22, %v738_v33  ;;  %v741_v40 = vsub.f32 %v724_v19, %v738_v33  ;;  %v739_v41 = vsub.f32 %v722_v18, %v738_v33  ;;  %v740_v8 = vsub.f32 %v723_v17, %v738_v33 }
 0x570   :  { %v749_v48 = vmul.f32 1.442695, %v742_v34  ;;  %v747_v42 = vmul.f32 1.442695, %v741_v40  ;;  %v743_v43 = vmul.f32 1.442695, %v739_v41  ;;  %v2523_v9 = vpop.trf.xlu1 }
 0x571   :  { %v745_v54 = vmul.f32 1.442695, %v740_v8 }
 0x572   :  { %1770 = vpow2.f32 %v749_v48 }
 0x573   :  { %1772 = vpow2.f32 %v747_v42 }
 0x574   :  { %1774 = vpow2.f32 %v743_v43 }
 0x575   :  { %1776 = vpow2.f32 %v745_v54 }
 0x578   :  { %v2487_v57 = vpop.eup %1770 }
 0x579   :  { %v2489_v45 = vpop.eup %1772 }
 0x57a   :  { %v2491_v49 = vpop.eup %1774  ;;  %v752_v47 = vpack.c.bf16 %v2487_v57, %v2489_v45 }
 0x57b   :  { %v2495_v63 = vpop.eup %1776 }
 0x57c   :  { %799 = vmatpush.bf16.msrb.mxu0 %v752_v47  ;;  %v751_v0 = vpack.c.bf16 %v2495_v63, %v2491_v49 }
 0x580   :  { %800 = vmatpush.bf16.msrb.mxu0 %v751_v0  ;;  %v2527_v37 = vpop.trf.xlu1  ;;  %v1742_v0 = vld [vmem:[%s2949_s4] sm:$0xff] }
 0x583   :  { %1691 = vmatmul.msk.bf16.vlgmr.msrb.gmra.mxu0 %vm438_vm5, %v2499_v2 }
 0x593   :  { %1692 = vmatmul.msk.bf16.gmra.mxu0 %vm438_vm5, %v2503_v3 }
 0x5a3   :  { %1693 = vmatmul.msk.bf16.gmra.mxu0 %vm438_vm5, %v2507_v4 }
 0x5b3   :  { %1694 = vmatmul.msk.bf16.gmra.mxu0 %vm438_vm5, %v2511_v5 }
 0x5c3   :  { %1695 = vmatmul.msk.bf16.gmra.mxu0 %vm438_vm5, %v2515_v6 }
 0x5d3   :  { %1696 = vmatmul.msk.bf16.gmra.mxu0 %vm438_vm5, %v2519_v7 }
 0x5e3   :  { %1697 = vmatmul.msk.bf16.gmra.mxu0 %vm438_vm5, %v2523_v9 }
 0x5f3   :  { %1698 = vmatmul.msk.bf16.gmra.mxu0 %vm438_vm5, %v2527_v37 }
 0x600   :  { %v802_v10 = vpop.f32.mrf.mxu0 }
 0x608   :  { %v804_v39 = vpop.f32.mrf.mxu0 }
 0x609   :  { %v842_v30 = vpack.c.bf16 %v804_v39, %v802_v10 }
 0x610   :  { %v807_v11 = vpop.f32.mrf.mxu0 }
 0x618   :  { %v809_v12 = vpop.f32.mrf.mxu0 }
 0x619   :  { %v843_v29 = vpack.c.bf16 %v809_v12, %v807_v11 }
 0x620   :  { %v812_v36 = vpop.f32.mrf.mxu0 }
 0x628   :  { %v814_v13 = vpop.f32.mrf.mxu0 }
 0x629   :  { %v844_v28 = vpack.c.bf16 %v814_v13, %v812_v36 }
 0x630   :  { %v817_v14 = vpop.f32.mrf.mxu0 }
 0x638   :  { %v819_v15 = vpop.f32.mrf.mxu0 }
 0x639   :  { %v845_v27 = vpack.c.bf16 %v819_v15, %v817_v14 }
 0x640   :  { %v822_v16 = vpop.f32.mrf.mxu0 }
 0x648   :  { %v824_v17 = vpop.f32.mrf.mxu0 }
 0x649   :  { %v846_v26 = vpack.c.bf16 %v824_v17, %v822_v16 }
 0x650   :  { %v827_v35 = vpop.f32.mrf.mxu0 }
 0x658   :  { %v829_v18 = vpop.f32.mrf.mxu0 }
 0x659   :  { %v847_v25 = vpack.c.bf16 %v829_v18, %v827_v35 }
 0x660   :  { %v832_v19 = vpop.f32.mrf.mxu0 }
 0x668   :  { %v834_v20 = vpop.f32.mrf.mxu0 }
 0x669   :  { %v848_v24 = vpack.c.bf16 %v834_v20, %v832_v19 }
 0x670   :  { %v837_v21 = vpop.f32.mrf.mxu0 }
 0x678   :  { %v839_v22 = vpop.f32.mrf.mxu0 }
 0x679   :  { %v849_v23 = vpack.c.bf16 %v839_v22, %v837_v21 }
 0x67b   :  { %850 = vmatpush.bf16.msra.mxu1 %v849_v23 }
 0x67f   :  { %851 = vmatpush.bf16.msra.mxu1 %v848_v24 }
 0x683   :  { %852 = vmatpush.bf16.msra.mxu1 %v847_v25 }
 0x687   :  { %853 = vmatpush.bf16.msra.mxu1 %v846_v26 }
 0x68b   :  { %854 = vmatpush.bf16.msra.mxu1 %v845_v27  ;;  %v1016_v27 = vld [vmem:[%s2958_s13 + $0x78] sm:$0xff] }
 0x68c   :  { %1017 = vmatpush.msrb.mxu3 %v1016_v27  ;;  %v1008_v27 = vld [vmem:[%s2958_s13 + $0x38] sm:$0xff] }
 0x68f   :  { %855 = vmatpush.bf16.msra.mxu1 %v844_v28  ;;  %v1015_v28 = vld [vmem:[%s2958_s13 + $0x70] sm:$0xff] }
 0x690   :  { %1018 = vmatpush.msrb.mxu3 %v1015_v28  ;;  %v985_v28 = vld [vmem:[%s2957_s12] sm:$0xff] }
 0x693   :  { %856 = vmatpush.bf16.msra.mxu1 %v843_v29  ;;  %v1014_v29 = vld [vmem:[%s2958_s13 + $0x68] sm:$0xff] }
 0x694   :  { %1019 = vmatpush.msrb.mxu3 %v1014_v29  ;;  %v1007_v29 = vld [vmem:[%s2958_s13 + $0x30] sm:$0xff] }
 0x697   :  { %857 = vmatpush.bf16.msra.mxu1 %v842_v30  ;;  %v1072_v30 = vld [vmem:[%s2959_s14 + $0x78] sm:$0xff] }
 0x69a   :  { %858 = vmatmul.bf16.vlgmr.msra.gmra.mxu1 %v2262_v55 }
 0x6aa   :  { %863 = vmatmul.bf16.gmra.mxu1 %v2268_v59 }
 0x717   :  { %v859_v1 = vpop.f32.mrf.mxu1 }
 0x718   :  { %v860_v34 = vadd.f32 1e-12, %v859_v1  ;;  %v1013_v1 = vld [vmem:[%s2958_s13 + $0x60] sm:$0xff] }
 0x719   :  { %1020 = vmatpush.msrb.mxu3 %v1013_v1  ;;  %v1005_v1 = vld [vmem:[%s2958_s13 + $0x20] sm:$0xff] }
 0x71f   :  { %v861_v31 = vpop.f32.mrf.mxu1 }
 0x720   :  { %v862_v42 = vadd.f32 1e-12, %v861_v31  ;;  %v1071_v31 = vld [vmem:[%s2959_s14 + $0x70] sm:$0xff] }
 0x727   :  { %v864_v32 = vpop.f32.mrf.mxu1 }
 0x728   :  { %v865_v33 = vadd.f32 1e-12, %v864_v32  ;;  %v1070_v32 = vld [vmem:[%s2959_s14 + $0x68] sm:$0xff] }
 0x72a   :  { %1778 = vrcp.f32 %v865_v33  ;;  %v1012_v33 = vld [vmem:[%s2958_s13 + $0x58] sm:$0xff] }
 0x72b   :  { %1780 = vrcp.f32 %v860_v34  ;;  %v1011_v34 = vld [vmem:[%s2958_s13 + $0x50] sm:$0xff]  ;;  %1021 = vmatpush.msrb.mxu3 %v1012_v33  ;;  %v1002_v33 = vld [vmem:[%s2958_s13 + $0x8] sm:$0xff] }
 0x72d   :  { %1022 = vmatpush.msrb.mxu3 %v1011_v34  ;;  %v1001_v34 = vld [vmem:[%s2958_s13] sm:$0xff] }
 0x72f   :  { %v866_v40 = vpop.f32.mrf.mxu1 }
 0x730   :  { %v1779_v41 = vpop.eup %1778  ;;  %v867_v8 = vadd.f32 1e-12, %v866_v40  ;;  %v1010_v40 = vld [vmem:[%s2958_s13 + $0x48] sm:$0xff] }
 0x731   :  { %v2534_v48 = vmul.f32 %v1779_v41, %v2489_v45  ;;  %v1781_v55 = vpop.eup %1780  ;;  %1023 = vmatpush.msrb.mxu3 %v1010_v40  ;;  %v1000_v41 = vld [vmem:[%s2957_s12 + $0x78] sm:$0xff] }
 0x732   :  { %1782 = vrcp.f32 %v867_v8  ;;  %v2541_v54 = vmul.f32 %v1781_v55, %v2491_v49  ;;  %v998_v55 = vld [vmem:[%s2957_s12 + $0x68] sm:$0xff] }
 0x733   :  { %889 = vperm.xlu2 %1752, %v2534_v48   ;;  %1784 = vrcp.f32 %v862_v42  ;;  %v999_v42 = vld [vmem:[%s2957_s12 + $0x70] sm:$0xff] }
 0x738   :  { %v1783_v43 = vpop.eup %1782 }
 0x739   :  { %v2538_v59 = vmul.f32 %v1783_v43, %v2487_v57  ;;  %v1785_v47 = vpop.eup %1784  ;;  %v1743_v57 = vld [vmem:[%s2949_s4 + $0x8] sm:$0xff]  ;;  %v997_v43 = vld [vmem:[%s2957_s12 + $0x60] sm:$0xff] }
 0x73a   :  { %v2546_v45 = vmul.f32 %v1785_v47, %v2495_v63  ;;  %v996_v47 = vld [vmem:[%s2957_s12 + $0x58] sm:$0xff] }
 0x73b   :  { %894 = vperm.xlu0 %1753, %v2538_v59   ;;  %879 = vperm.xlu2 %1752, %v2541_v54  }
 0x743   :  { %884 = vperm.xlu2 %1752, %v2546_v45  }
 0x769   :  { %927 = vxpose.xlu2.c.b16.start [1/2] (short) (narrow) %v1742_v0, 16  ;;  %v995_v0 = vld [vmem:[%s2957_s12 + $0x50] sm:$0xff] }
 0x779   :  { %928 = vxpose.xlu2.c.b16.end [2/2] (short) (narrow) %v1743_v57, 16  ;;  %v994_v57 = vld [vmem:[%s2957_s12 + $0x48] sm:$0xff] }
 0x78d   :  { %v890_v49 = vpop.permute.xlu2 %889 }
 0x78e   :  { %v899_v12 = vmul.f32 %v890_v49, %v2253_v52  ;;  %v911_v63 = vmul.f32 %v890_v49, %v2299_v61  ;;  %v905_v20 = vmul.f32 %v890_v49, %v2445_v38  ;;  %v1069_v49 = vld [vmem:[%s2959_s14 + $0x60] sm:$0xff] }
 0x795   :  { %v880_v10 = vpop.permute.xlu2 %879 }
 0x796   :  { %v897_v18 = vmul.f32 %v880_v10, %v2247_v50  ;;  %v909_v19 = vmul.f32 %v880_v10, %v2293_v56  ;;  %v903_v25 = vmul.f32 %v880_v10, %v2464_v46  ;;  %v1068_v10 = vld [vmem:[%s2959_s14 + $0x58] sm:$0xff] }
 0x79d   :  { %v885_v39 = vpop.permute.xlu2 %884 }
 0x79e   :  { %v898_v14 = vmul.f32 %v885_v39, %v2250_v51  ;;  %v910_v15 = vmul.f32 %v885_v39, %v2296_v58  ;;  %v904_v23 = vmul.f32 %v885_v39, %v2473_v60  ;;  %v1067_v39 = vld [vmem:[%s2959_s14 + $0x50] sm:$0xff] }
 0x7a0   :  { %v901_v21 = vpack.c.bf16 %v898_v14, %v897_v18  ;;  %v913_v22 = vpack.c.bf16 %v910_v15, %v909_v19  ;;  %v907_v26 = vpack.c.bf16 %v904_v23, %v903_v25  ;;  %v1062_v14 = vld [vmem:[%s2959_s14 + $0x28] sm:$0xff]  ;;  %v992_v15 = vld [vmem:[%s2957_s12 + $0x38] sm:$0xff]  ;;  %v1059_v19 = vld [vmem:[%s2959_s14 + $0x10] sm:$0xff] }
 0x7a1   :  { %v990_v18 = vld [vmem:[%s2957_s12 + $0x28] sm:$0xff]  ;;  %v1057_v23 = vld [vmem:[%s2959_s14] sm:$0xff] }
 0x7a2   :  { %v986_v25 = vld [vmem:[%s2957_s12 + $0x8] sm:$0xff] }
 0x7ad   :  { %v895_v11 = vpop.permute.xlu0 %894 }
 0x7ae   :  { %v900_v36 = vmul.f32 %v895_v11, %v2256_v53  ;;  %v912_v13 = vmul.f32 %v895_v11, %v2301_v62  ;;  %v906_v35 = vmul.f32 %v895_v11, %v2461_v44  ;;  %v1066_v11 = vld [vmem:[%s2959_s14 + $0x48] sm:$0xff] }
 0x7b0   :  { %v902_v16 = vpack.c.bf16 %v900_v36, %v899_v12  ;;  %v914_v17 = vpack.c.bf16 %v912_v13, %v911_v63  ;;  %v908_v24 = vpack.c.bf16 %v906_v35, %v905_v20  ;;  %v1065_v12 = vld [vmem:[%s2959_s14 + $0x40] sm:$0xff]  ;;  %v1064_v63 = vld [vmem:[%s2959_s14 + $0x38] sm:$0xff]  ;;  %v1063_v36 = vld [vmem:[%s2959_s14 + $0x30] sm:$0xff] }
 0x7b1   :  { %v993_v13 = vld [vmem:[%s2957_s12 + $0x40] sm:$0xff]  ;;  %v1060_v35 = vld [vmem:[%s2959_s14 + $0x18] sm:$0xff] }
 0x7b2   :  { %952 = vmatpush.bf16.msrb.mxu2 %v902_v16  ;;  %978 = vmatpush.bf16.msrb.mxu1 %v914_v17  ;;  %v1061_v16 = vld [vmem:[%s2959_s14 + $0x20] sm:$0xff]  ;;  %v991_v17 = vld [vmem:[%s2957_s12 + $0x30] sm:$0xff] }
 0x7b3   :  { %v989_v20 = vld [vmem:[%s2957_s12 + $0x20] sm:$0xff] }
 0x7b6   :  { %953 = vmatpush.bf16.msrb.mxu2 %v901_v21  ;;  %979 = vmatpush.bf16.msrb.mxu1 %v913_v22  ;;  %v1058_v21 = vld [vmem:[%s2959_s14 + $0x8] sm:$0xff]  ;;  %v988_v22 = vld [vmem:[%s2957_s12 + $0x18] sm:$0xff] }
 0x7ba   :  { %965 = vmatpush.bf16.msra.mxu2 %v908_v24  ;;  %1073 = vmatpush.msra.mxu1 %v1072_v30  ;;  %v987_v24 = vld [vmem:[%s2957_s12 + $0x10] sm:$0xff]  ;;  %v1006_v30 = vld [vmem:[%s2958_s13 + $0x28] sm:$0xff] }
 0x7bc   :  { %1074 = vmatpush.msra.mxu1 %v1071_v31  ;;  %v1004_v31 = vld [vmem:[%s2958_s13 + $0x18] sm:$0xff] }
 0x7be   :  { %966 = vmatpush.bf16.msra.mxu2 %v907_v26  ;;  %1075 = vmatpush.msra.mxu1 %v1070_v32  ;;  %v1009_v26 = vld [vmem:[%s2958_s13 + $0x40] sm:$0xff]  ;;  %v1003_v32 = vld [vmem:[%s2958_s13 + $0x10] sm:$0xff] }
 0x7bf   :  { %1024 = vmatpush.msrb.mxu3 %v1009_v26 }
 0x7c0   :  { %1076 = vmatpush.msra.mxu1 %v1069_v49 }
 0x7c1   :  { %1025 = vmatpush.msrb.mxu3 %v1008_v27 }
 0x7c2   :  { %1077 = vmatpush.msra.mxu1 %v1068_v10 }
 0x7c3   :  { %1026 = vmatpush.msrb.mxu3 %v1007_v29 }
 0x7c4   :  { %1078 = vmatpush.msra.mxu1 %v1067_v39 }
 0x7c5   :  { %1027 = vmatpush.msrb.mxu3 %v1006_v30  ;;  %v72_v30 = vld [vmem:[%s2949_s4] sm:$0xff]  }
 0x7c6   :  { %1079 = vmatpush.msra.mxu1 %v1066_v11 }
 0x7c7   :  { %1028 = vmatpush.msrb.mxu3 %v1005_v1 }
 0x7c8   :  { %1080 = vmatpush.msra.mxu1 %v1065_v12 }
 0x7c9   :  { %1029 = vmatpush.msrb.mxu3 %v1004_v31  ;;  %v1121_v31 = vunpack.c.l.bf16 %v72_v30 }
 0x7ca   :  { %1081 = vmatpush.msra.mxu1 %v1064_v63 }
 0x7cb   :  { %1030 = vmatpush.msrb.mxu3 %v1003_v32 }
 0x7cc   :  { %1082 = vmatpush.msra.mxu1 %v1063_v36 }
 0x7cd   :  { %1031 = vmatpush.msrb.mxu3 %v1002_v33  ;;  %v1122_v33 = vunpack.c.h.bf16 %v72_v30  ;;  %v1375_v30 = vld [vmem:[%s2961_s16 + $0x18] sm:$0xff] }
 0x7ce   :  { %1083 = vmatpush.msra.mxu1 %v1062_v14 }
 0x7cf   :  { %1032 = vmatpush.msrb.mxu3 %v1001_v34  ;;  %v74_v34 = vld [vmem:[%s2949_s4 + $0x8] sm:$0xff]  }
 0x7d0   :  { %1084 = vmatpush.msra.mxu1 %v1061_v16 }
 0x7d2   :  { %1085 = vmatpush.msra.mxu1 %v1060_v35 }
 0x7d4   :  { %1086 = vmatpush.msra.mxu1 %v1059_v19 }
 0x7d6   :  { %1087 = vmatpush.msra.mxu1 %v1058_v21 }
 0x7d8   :  { %1088 = vmatpush.msra.mxu1 %v1057_v23 }
 0x80a   :  { %v935_v8 = vpop.trf.xlu2 }
 0x80b   :  { %1707 = vmatmul.msk.bf16.vlgmr.msrb.gmra.mxu2 %vm438_vm5, %v935_v8  ;;  %1709 = vmatmul.msk.bf16.vlgmr.msrb.gmra.mxu1 %vm438_vm5, %v935_v8 }
 0x80c   :  { %1037 = vmatpush.msrb.mxu2 %v1000_v41 }
 0x80e   :  { %1038 = vmatpush.msrb.mxu2 %v999_v42 }
 0x810   :  { %1039 = vmatpush.msrb.mxu2 %v998_v55 }
 0x812   :  { %1040 = vmatpush.msrb.mxu2 %v997_v43 }
 0x814   :  { %1041 = vmatpush.msrb.mxu2 %v996_v47  ;;  %v1097_v47 = vlaneseq }
 0x816   :  { %1042 = vmatpush.msrb.mxu2 %v995_v0  ;;  %v1098_v10 = vshrl.u32 %v1097_v47, 7 }
 0x818   :  { %1043 = vmatpush.msrb.mxu2 %v994_v57  ;;  %vm1099_vm11 = vcmp.lt.s32.totalorder %v1098_v10, 4 }
 0x81a   :  { %1044 = vmatpush.msrb.mxu2 %v993_v13 }
 0x81b   :  { %1708 = vmatmul.msk.bf16.vlgmr.msra.gmra.mxu2 %vm438_vm5, %v935_v8 }
 0x81c   :  { %1045 = vmatpush.msrb.mxu2 %v992_v15 }
 0x81e   :  { %1046 = vmatpush.msrb.mxu2 %v991_v17 }
 0x820   :  { %1047 = vmatpush.msrb.mxu2 %v990_v18 }
 0x822   :  { %1048 = vmatpush.msrb.mxu2 %v989_v20 }
 0x824   :  { %1049 = vmatpush.msrb.mxu2 %v988_v22 }
 0x826   :  { %1050 = vmatpush.msrb.mxu2 %v987_v24 }
 0x828   :  { %1051 = vmatpush.msrb.mxu2 %v986_v25 }
 0x82a   :  { %1052 = vmatpush.msrb.mxu2 %v985_v28 }
 0x888   :  { %v981_v40 = vpop.f32.mrf.mxu1 }
 0x889   :  { %1089 = vmatmul.f32.vlgmr.msra.gmra.mxu1 %v981_v40  ;;  %v1123_v40 = vunpack.c.l.bf16 %v74_v34 }
 0x88e   :  { %v955_v41 = vpop.f32.mrf.mxu2 }
 0x88f   :  { %1053 = vmatmul.f32.vlgmr.msrb.gmra.mxu2 %v955_v41  ;;  %v1124_v41 = vunpack.c.h.bf16 %v74_v34  ;;  %v1360_v34 = vld [vmem:[%s2960_s15 + $0x20] sm:$0xff] }
 0x890   :  { %v983_v8 = vpop.f32.mrf.mxu1 }
 0x896   :  { %v957_v42 = vpop.f32.mrf.mxu2 }
 0x89e   :  { %v968_v55 = vpop.f32.mrf.mxu2 }
 0x89f   :  { %1033 = vmatmul.f32.vlgmr.msrb.gmra.mxu3 %v968_v55 }
 0x8a6   :  { %v970_v43 = vpop.f32.mrf.mxu2 }
 0x906   :  { %v1090_v39 = vpop.f32.mrf.mxu1 }
 0x912   :  { %v1054_v57 = vpop.f32.mrf.mxu2 }
 0x922   :  { %v1034_v0 = vpop.f32.mrf.mxu3 }
 0x923   :  { %v1055_v49 = vadd.f32 %v1054_v57, %v1034_v0 }
 0x925   :  { %v1093_v11 = vadd.f32 %v1090_v39, %v1055_v49 }
 0x927   :  { %vm1094_vm10 = vcmp.ge.f32.partialorder %v1093_v11, 0.0  ;;  %v1095_v12 = vmul.f32 0.01, %v1093_v11 }
 0x929   :  { %v1096_v63 = vsel %vm1094_vm10, %v1093_v11, %v1095_v12 }
 0x92a   :  { %v1100_v36 = vsel %vm1099_vm11, %v1096_v63, -1e+30 }
 0x92b   :  { %v1101_v13 = vsel %vm394_vm3, %v1100_v36, -inf }
 0x92c   :  { %v1102_v14 = vrot.slane %v1101_v13, 4 }
 0x92e   :  { %v1103_v15 = vmax.f32 %v1101_v13, %v1102_v14 }
 0x930   :  { %v1104_v16 = vrot.slane %v1103_v15, 2 }
 0x932   :  { %v1105_v17 = vmax.f32 %v1103_v15, %v1104_v16 }
 0x934   :  { %v1106_v35 = vrot.slane %v1105_v17, 1 }
 0x936   :  { %v1107_v18 = vmax.f32 %v1105_v17, %v1106_v35  ;;  %v1383_v35 = vld [vmem:[%s2961_s16 + $0x58] sm:$0xff] }
 0x938   :  { %v1108_v19 = vsub.f32 %v1100_v36, %v1107_v18  ;;  %v1368_v18 = vld [vmem:[%s2960_s15 + $0x60] sm:$0xff] }
 0x93a   :  { %v1109_v20 = vmul.f32 1.442695, %v1108_v19  ;;  %v1382_v19 = vld [vmem:[%s2961_s16 + $0x50] sm:$0xff] }
 0x93c   :  { %1786 = vpow2.f32 %v1109_v20  ;;  %v1367_v20 = vld [vmem:[%s2960_s15 + $0x58] sm:$0xff] }
 0x942   :  { %v1787_v21 = vpop.eup %1786 }
 0x943   :  { %v1111_v22 = vsel %vm1099_vm11, %v1787_v21, 0.0  ;;  %v1381_v21 = vld [vmem:[%s2961_s16 + $0x48] sm:$0xff] }
 0x944   :  { %v1112_v23 = vsel %vm394_vm3, %v1111_v22, 0.0 }
 0x945   :  { %v1113_v24 = vrot.slane %v1112_v23, 4 }
 0x947   :  { %v1114_v25 = vadd.f32 %v1113_v24, %v1112_v23  ;;  %v1380_v23 = vld [vmem:[%s2961_s16 + $0x40] sm:$0xff]  ;;  %v1379_v24 = vld [vmem:[%s2961_s16 + $0x38] sm:$0xff] }
 0x949   :  { %v1115_v26 = vrot.slane %v1114_v25, 2 }
 0x94b   :  { %v1116_v27 = vadd.f32 %v1115_v26, %v1114_v25  ;;  %v1378_v25 = vld [vmem:[%s2961_s16 + $0x30] sm:$0xff]  ;;  %v1365_v26 = vld [vmem:[%s2960_s15 + $0x48] sm:$0xff] }
 0x94d   :  { %v1117_v28 = vrot.slane %v1116_v27, 1 }
 0x94f   :  { %v1118_v29 = vadd.f32 %v1117_v28, %v1116_v27  ;;  %v1377_v27 = vld [vmem:[%s2961_s16 + $0x28] sm:$0xff]  ;;  %v1364_v28 = vld [vmem:[%s2960_s15 + $0x40] sm:$0xff] }
 0x951   :  { %1788 = vrcp.f32 %v1118_v29  ;;  %v1363_v29 = vld [vmem:[%s2960_s15 + $0x38] sm:$0xff] }
 0x957   :  { %v1789_v1 = vpop.eup %1788 }
 0x958   :  { %v1120_v32 = vmul.f32 %v1789_v1, %v1111_v22  ;;  %v1366_v22 = vld [vmem:[%s2960_s15 + $0x50] sm:$0xff] }
 0x959   :  { %v1362_v1 = vld [vmem:[%s2960_s15 + $0x30] sm:$0xff] }
 0x95a   :  { %1153 = vmatpush.msra.mxu3 %v1120_v32  ;;  %v1361_v32 = vld [vmem:[%s2960_s15 + $0x28] sm:$0xff] }
 0x95b   :  { %1710 = vmatmul.msk.f32.vlgmr.msra.gmra.mxu3 %vm1125_vm12, %v1121_v31  ;;  %v1374_v31 = vld [vmem:[%s2961_s16 + $0x10] sm:$0xff] }
 0x963   :  { %1711 = vmatmul.msk.f32.gmra.mxu3 %vm1125_vm12, %v1122_v33  ;;  %v1373_v33 = vld [vmem:[%s2961_s16 + $0x8] sm:$0xff] }
 0x96b   :  { %1712 = vmatmul.msk.f32.gmra.mxu3 %vm1125_vm12, %v1123_v40  ;;  %v1372_v40 = vld [vmem:[%s2961_s16] sm:$0xff] }
 0x973   :  { %1713 = vmatmul.msk.f32.gmra.mxu3 %vm1125_vm12, %v1124_v41  ;;  %v1359_v41 = vld [vmem:[%s2960_s15 + $0x18] sm:$0xff] }
 0x9de   :  { %v1155_v8 = vpop.f32.mrf.mxu3 }
 0x9df   :  { %v1167_v42 = vmul.f32 %v1155_v8, %v2541_v54  ;;  %v1358_v8 = vld [vmem:[%s2960_s15 + $0x10] sm:$0xff] }
 0x9e1   :  { %1173 = vperm.xlu2 %1752, %v1167_v42   ;;  %v1357_v42 = vld [vmem:[%s2960_s15 + $0x8] sm:$0xff] }
 0x9e6   :  { %v1158_v55 = vpop.f32.mrf.mxu3 }
 0x9e7   :  { %v1168_v49 = vmul.f32 %v1158_v55, %v2546_v45  ;;  %v1356_v55 = vld [vmem:[%s2960_s15] sm:$0xff] }
 0x9ee   :  { %v1161_v43 = vpop.f32.mrf.mxu3 }
 0x9ef   :  { %v1169_v47 = vmul.f32 %v1161_v43, %v2534_v48  ;;  %v1532_v43 = vld [vmem:[%s2962_s17 + $0x70] sm:$0xff] }
 0x9f1   :  { %1183 = vperm.xlu1 %1751, %v1169_v47   ;;  %v1531_v47 = vld [vmem:[%s2962_s17 + $0x68] sm:$0xff] }
 0x9f6   :  { %v1164_v0 = vpop.f32.mrf.mxu3 }
 0x9f7   :  { %v1170_v57 = vmul.f32 %v1164_v0, %v2538_v59  ;;  %v1530_v0 = vld [vmem:[%s2962_s17 + $0x60] sm:$0xff] }
 0x9f9   :  { %1188 = vperm.xlu2 %1752, %v1170_v57   ;;  %v1529_v57 = vld [vmem:[%s2962_s17 + $0x58] sm:$0xff] }
 0xa01   :  { %1178 = vperm.xlu2 %1752, %v1168_v49   ;;  %v1528_v49 = vld [vmem:[%s2962_s17 + $0x50] sm:$0xff] }
 0xa3b   :  { %v1174_v10 = vpop.permute.xlu2 %1173 }
 0xa3c   :  { %v1191_v45 = vmul.f32 %v1174_v10, %v2247_v50  ;;  %v1246_v16 = vmul.f32 %v1174_v10, %v2464_v46  ;;  %v1370_v46 = vld [vmem:[%s2960_s15 + $0x70] sm:$0xff] }
 0xa53   :  { %v1189_v39 = vpop.permute.xlu2 %1188 }
 0xa54   :  { %v1194_v63 = vmul.f32 %v1189_v39, %v2256_v53  ;;  %v1249_v54 = vmul.f32 %v1189_v39, %v2461_v44  ;;  %v1304_v53 = vmul.f32 %v1189_v39, %v2301_v62  ;;  %v1371_v62 = vld [vmem:[%s2960_s15 + $0x78] sm:$0xff] }
 0xa5b   :  { %v1179_v11 = vpop.permute.xlu2 %1178 }
 0xa5c   :  { %v1192_v13 = vmul.f32 %v1179_v11, %v2250_v51  ;;  %v1247_v59 = vmul.f32 %v1179_v11, %v2473_v60  ;;  %v1301_v60 = vmul.f32 %v1174_v10, %v2293_v56  ;;  %v1387_v56 = vld [vmem:[%s2961_s16 + $0x78] sm:$0xff]  ;;  %v1527_v10 = vld [vmem:[%s2962_s17 + $0x48] sm:$0xff] }
 0xa5d   :  { %1388 = vmatpush.msra.mxu0 %v1387_v56 }
 0xa5e   :  { %v1250_v44 = vpack.c.bf16 %v1247_v59, %v1246_v16  ;;  %v1522_v59 = vld [vmem:[%s2962_s17 + $0x20] sm:$0xff]  ;;  %v1519_v16 = vld [vmem:[%s2962_s17 + $0x8] sm:$0xff] }
 0xa63   :  { %v1184_v12 = vpop.permute.xlu1 %1183 }
 0xa64   :  { %v1193_v36 = vmul.f32 %v1184_v12, %v2253_v52  ;;  %v1248_v48 = vmul.f32 %v1184_v12, %v2445_v38  ;;  %v1303_v17 = vmul.f32 %v1184_v12, %v2299_v61  ;;  %v1195_v52 = vpack.c.bf16 %v1192_v13, %v1191_v45  ;;  %v1385_v61 = vld [vmem:[%s2961_s16 + $0x68] sm:$0xff]  ;;  %v1526_v12 = vld [vmem:[%s2962_s17 + $0x40] sm:$0xff]  ;;  %v1520_v45 = vld [vmem:[%s2962_s17 + $0x10] sm:$0xff] }
 0xa65   :  { %v1302_v38 = vmul.f32 %v1179_v11, %v2296_v58  ;;  %v1386_v58 = vld [vmem:[%s2961_s16 + $0x70] sm:$0xff] }
 0xa66   :  { %v1196_v14 = vpack.c.bf16 %v1194_v63, %v1193_v36  ;;  %v1251_v15 = vpack.c.bf16 %v1249_v54, %v1248_v48  ;;  %v1306_v51 = vpack.c.bf16 %v1304_v53, %v1303_v17  ;;  %1389 = vmatpush.msra.mxu0 %v1386_v58  ;;  %v1524_v54 = vld [vmem:[%s2962_s17 + $0x30] sm:$0xff]  ;;  %v1523_v36 = vld [vmem:[%s2962_s17 + $0x28] sm:$0xff] }
 0xa67   :  { %v1305_v50 = vpack.c.bf16 %v1302_v38, %v1301_v60 }
 0xa68   :  { %1203 = vmatpush.bf16.msra.mxu2 %v1196_v14  ;;  %1258 = vmatpush.bf16.msrb.mxu1 %v1251_v15 }
 0xa69   :  { %1744 = vmatpush.bf16.msrb.mxu3 %v1251_v15  ;;  %1390 = vmatpush.msra.mxu0 %v1385_v61  ;;  %v1521_v15 = vld [vmem:[%s2962_s17 + $0x18] sm:$0xff] }
 0xa6c   :  { %1204 = vmatpush.bf16.msra.mxu2 %v1195_v52  ;;  %1259 = vmatpush.bf16.msrb.mxu1 %v1250_v44  ;;  %v1518_v52 = vld [vmem:[%s2962_s17] sm:$0xff] }
 0xa6d   :  { %1745 = vmatpush.bf16.msrb.mxu3 %v1250_v44 }
 0xa6f   :  { %1714 = vmatmul.msk.bf16.vlgmr.msra.gmra.mxu2 %vm438_vm5, %v2499_v2  ;;  %1722 = vmatmul.msk.bf16.vlgmr.msrb.gmra.mxu1 %vm438_vm5, %v2499_v2 }
 0xa70   :  { %1727 = vmatmul.msk.bf16.vlgmr.msrb.gmra.mxu3 %vm438_vm5, %v2519_v7  ;;  %1453 = vmatpush.msrb.mxu2 %v1371_v62 }
 0xa71   :  { %1313 = vmatpush.bf16.msra.mxu3 %v1306_v51 }
 0xa72   :  { %1454 = vmatpush.msrb.mxu2 %v1370_v46 }
 0xa75   :  { %1314 = vmatpush.bf16.msra.mxu3 %v1305_v50 }
 0xa7f   :  { %1715 = vmatmul.msk.bf16.gmra.mxu2 %vm438_vm5, %v2503_v3  ;;  %1723 = vmatmul.msk.bf16.gmra.mxu1 %vm438_vm5, %v2503_v3 }
 0xa80   :  { %1728 = vmatmul.msk.bf16.gmra.mxu3 %vm438_vm5, %v2523_v9 }
 0xa8f   :  { %1716 = vmatmul.msk.bf16.gmra.mxu2 %vm438_vm5, %v2507_v4  ;;  %1724 = vmatmul.msk.bf16.gmra.mxu1 %vm438_vm5, %v2507_v4 }
 0xa90   :  { %1729 = vmatmul.msk.bf16.gmra.mxu3 %vm438_vm5, %v2527_v37 }
 0xa9f   :  { %1717 = vmatmul.msk.bf16.gmra.mxu2 %vm438_vm5, %v2511_v5  ;;  %1725 = vmatmul.msk.bf16.gmra.mxu1 %vm438_vm5, %v2511_v5 }
 0xaa0   :  { %1730 = vmatmul.msk.bf16.vlgmr.msra.gmra.mxu3 %vm438_vm5, %v2499_v2  ;;  %v1384_v2 = vld [vmem:[%s2961_s16 + $0x60] sm:$0xff] }
 0xaa1   :  { %1391 = vmatpush.msra.mxu0 %v1384_v2 }
 0xaa3   :  { %1392 = vmatpush.msra.mxu0 %v1383_v35 }
 0xaa5   :  { %1393 = vmatpush.msra.mxu0 %v1382_v19 }
 0xaa7   :  { %1394 = vmatpush.msra.mxu0 %v1381_v21 }
 0xaa9   :  { %1395 = vmatpush.msra.mxu0 %v1380_v23 }
 0xaab   :  { %1396 = vmatpush.msra.mxu0 %v1379_v24 }
 0xaad   :  { %1397 = vmatpush.msra.mxu0 %v1378_v25 }
 0xaaf   :  { %1718 = vmatmul.msk.bf16.gmra.mxu2 %vm438_vm5, %v2515_v6  ;;  %1726 = vmatmul.msk.bf16.gmra.mxu1 %vm438_vm5, %v2515_v6 }
 0xab0   :  { %1731 = vmatmul.msk.bf16.gmra.mxu3 %vm438_vm5, %v2503_v3  ;;  %v1369_v3 = vld [vmem:[%s2960_s15 + $0x68] sm:$0xff]  ;;  %1398 = vmatpush.msra.mxu0 %v1377_v27 }
 0xab1   :  { %1455 = vmatpush.msrb.mxu2 %v1369_v3 }
 0xab3   :  { %1456 = vmatpush.msrb.mxu2 %v1368_v18 }
 0xab5   :  { %1457 = vmatpush.msrb.mxu2 %v1367_v20 }
 0xab7   :  { %1458 = vmatpush.msrb.mxu2 %v1366_v22 }
 0xab9   :  { %1459 = vmatpush.msrb.mxu2 %v1365_v26 }
 0xabb   :  { %1460 = vmatpush.msrb.mxu2 %v1364_v28 }
 0xabd   :  { %1461 = vmatpush.msrb.mxu2 %v1363_v29 }
 0xabf   :  { %1719 = vmatmul.msk.bf16.gmra.mxu2 %vm438_vm5, %v2519_v7 }
 0xac0   :  { %1732 = vmatmul.msk.bf16.gmra.mxu3 %vm438_vm5, %v2507_v4  ;;  %v1376_v4 = vld [vmem:[%s2961_s16 + $0x20] sm:$0xff]  ;;  %1462 = vmatpush.msrb.mxu2 %v1362_v1 }
 0xac1   :  { %1399 = vmatpush.msra.mxu0 %v1376_v4 }
 0xac2   :  { %1463 = vmatpush.msrb.mxu2 %v1361_v32 }
 0xac3   :  { %1400 = vmatpush.msra.mxu0 %v1375_v30 }
 0xac4   :  { %1464 = vmatpush.msrb.mxu2 %v1360_v34 }
 0xac5   :  { %1401 = vmatpush.msra.mxu0 %v1374_v31 }
 0xac6   :  { %1465 = vmatpush.msrb.mxu2 %v1359_v41 }
 0xac7   :  { %1402 = vmatpush.msra.mxu0 %v1373_v33 }
 0xac8   :  { %1466 = vmatpush.msrb.mxu2 %v1358_v8 }
 0xac9   :  { %1403 = vmatpush.msra.mxu0 %v1372_v40 }
 0xaca   :  { %1467 = vmatpush.msrb.mxu2 %v1357_v42 }
 0xacc   :  { %1468 = vmatpush.msrb.mxu2 %v1356_v55 }
 0xacf   :  { %1720 = vmatmul.msk.bf16.gmra.mxu2 %vm438_vm5, %v2523_v9 }
 0xad0   :  { %1733 = vmatmul.msk.bf16.gmra.mxu3 %vm438_vm5, %v2511_v5  ;;  %v1533_v5 = vld [vmem:[%s2962_s17 + $0x78] sm:$0xff] }
 0xad1   :  { %1534 = vmatpush.msra.mxu1 %v1533_v5 }
 0xad3   :  { %1535 = vmatpush.msra.mxu1 %v1532_v43 }
 0xad5   :  { %1536 = vmatpush.msra.mxu1 %v1531_v47 }
 0xad7   :  { %1537 = vmatpush.msra.mxu1 %v1530_v0 }
 0xad9   :  { %1538 = vmatpush.msra.mxu1 %v1529_v57 }
 0xadb   :  { %1539 = vmatpush.msra.mxu1 %v1528_v49 }
 0xadd   :  { %1540 = vmatpush.msra.mxu1 %v1527_v10 }
 0xadf   :  { %1721 = vmatmul.msk.bf16.gmra.mxu2 %vm438_vm5, %v2527_v37  ;;  %1541 = vmatpush.msra.mxu1 %v1526_v12 }
 0xae0   :  { %1734 = vmatmul.msk.bf16.gmra.mxu3 %vm438_vm5, %v2515_v6 }
 0xaec   :  { %v1261_v6 = vpop.f32.mrf.mxu1 }
 0xaed   :  { %1404 = vmatmul.f32.vlgmr.msra.gmra.mxu0 %v1261_v6 }
 0xaf0   :  { %1735 = vmatmul.msk.bf16.gmra.mxu3 %vm438_vm5, %v2519_v7  ;;  %v1525_v7 = vld [vmem:[%s2962_s17 + $0x38] sm:$0xff]  ;;  %s1843_s17 = smov [#allocation4]  }
 0xaf1   :  { %1542 = vmatpush.msra.mxu1 %v1525_v7  ;;  %s1648_s28 = sshll.u32 %s1843_s17, 4  ;;  %s1649_s28 = int_to_ptr.vmem [resolvable:$true] %s1648_s28 }
 0xaf2   :  { %v1206_v39 = vpop.f32.mrf.mxu2  ;;  %1656 = dma.vmem_to_hbm [thread:$0]  %s1649_s28, 512, %s1651_s29, [#allocation5], %s1844_s0, %s1844_s0, %s1845_s30  }
 0xaf3   :  { %v2899_v11 = vpop.f32.mrf.mxu3  ;;  %1469 = vmatmul.f32.vlgmr.msrb.gmra.mxu2 %v1206_v39  ;;  %1543 = vmatpush.msra.mxu1 %v1524_v54 }
 0xaf4   :  { %v1263_v63 = vpop.f32.mrf.mxu1 }
 0xaf5   :  { %1407 = vmatmul.f32.gmra.mxu0 %v1263_v63  ;;  %1544 = vmatpush.msra.mxu1 %v1523_v36 }
 0xaf7   :  { %1545 = vmatpush.msra.mxu1 %v1522_v59 }
 0xaf9   :  { %1546 = vmatpush.msra.mxu1 %v1521_v15 }
 0xafa   :  { %v1208_v48 = vpop.f32.mrf.mxu2 }
 0xafb   :  { %v1288_v13 = vpop.f32.mrf.mxu3  ;;  %1472 = vmatmul.f32.gmra.mxu2 %v1208_v48  ;;  %1547 = vmatpush.msra.mxu1 %v1520_v45 }
 0xafc   :  { %v1266_v14 = vpop.f32.mrf.mxu1 }
 0xafd   :  { %1410 = vmatmul.f32.gmra.mxu0 %v1266_v14  ;;  %1548 = vmatpush.msra.mxu1 %v1519_v16 }
 0xaff   :  { %1549 = vmatpush.msra.mxu1 %v1518_v52 }
 0xb00   :  { %1736 = vmatmul.msk.bf16.gmra.mxu3 %vm438_vm5, %v2523_v9 }
 0xb02   :  { %v1211_v17 = vpop.f32.mrf.mxu2 }
 0xb03   :  { %v1291_v53 = vpop.f32.mrf.mxu3  ;;  %1475 = vmatmul.f32.gmra.mxu2 %v1211_v17 }
 0xb04   :  { %v1268_v44 = vpop.f32.mrf.mxu1 }
 0xb05   :  { %1413 = vmatmul.f32.gmra.mxu0 %v1268_v44 }
 0xb0a   :  { %v1213_v38 = vpop.f32.mrf.mxu2 }
 0xb0b   :  { %v1293_v51 = vpop.f32.mrf.mxu3  ;;  %1478 = vmatmul.f32.gmra.mxu2 %v1213_v38 }
 0xb0c   :  { %v1271_v60 = vpop.f32.mrf.mxu1 }
 0xb0d   :  { %1416 = vmatmul.f32.gmra.mxu0 %v1271_v60 }
 0xb10   :  { %1737 = vmatmul.msk.bf16.gmra.mxu3 %vm438_vm5, %v2527_v37 }
 0xb12   :  { %v1216_v9 = vpop.f32.mrf.mxu2 }
 0xb13   :  { %v1296_v50 = vpop.f32.mrf.mxu3  ;;  %1481 = vmatmul.f32.gmra.mxu2 %v1216_v9 }
 0xb14   :  { %v1273_v56 = vpop.f32.mrf.mxu1 }
 0xb15   :  { %1419 = vmatmul.f32.gmra.mxu0 %v1273_v56 }
 0xb1a   :  { %v1218_v58 = vpop.f32.mrf.mxu2 }
 0xb1b   :  { %v1298_v61 = vpop.f32.mrf.mxu3  ;;  %1484 = vmatmul.f32.gmra.mxu2 %v1218_v58 }
 0xb1c   :  { %v1276_v62 = vpop.f32.mrf.mxu1 }
 0xb1d   :  { %1422 = vmatmul.f32.gmra.mxu0 %v1276_v62 }
 0xb22   :  { %v1221_v46 = vpop.f32.mrf.mxu2 }
 0xb23   :  { %v1316_v2 = vpop.f32.mrf.mxu3  ;;  %1487 = vmatmul.f32.gmra.mxu2 %v1221_v46 }
 0xb24   :  { %1550 = vmatmul.f32.vlgmr.msra.gmra.mxu1 %v1316_v2  ;;  %v1278_v3 = vpop.f32.mrf.mxu1 }
 0xb25   :  { %1425 = vmatmul.f32.gmra.mxu0 %v1278_v3 }
 0xb2a   :  { %v1223_v35 = vpop.f32.mrf.mxu2 }
 0xb2b   :  { %v1318_v18 = vpop.f32.mrf.mxu3  ;;  %1490 = vmatmul.f32.gmra.mxu2 %v1223_v35 }
 0xb2c   :  { %1553 = vmatmul.f32.gmra.mxu1 %v1318_v18  ;;  %v1281_v37 = vpop.f32.mrf.mxu1 }
 0xb2d   :  { %1428 = vmatmul.f32.gmra.mxu0 %v1281_v37 }
 0xb32   :  { %v1226_v19 = vpop.f32.mrf.mxu2 }
 0xb33   :  { %v1321_v20 = vpop.f32.mrf.mxu3  ;;  %1493 = vmatmul.f32.gmra.mxu2 %v1226_v19 }
 0xb34   :  { %1556 = vmatmul.f32.gmra.mxu1 %v1321_v20  ;;  %v1283_v21 = vpop.f32.mrf.mxu1 }
 0xb35   :  { %1431 = vmatmul.f32.gmra.mxu0 %v1283_v21 }
 0xb3a   :  { %v1228_v22 = vpop.f32.mrf.mxu2 }
 0xb3b   :  { %v1323_v23 = vpop.f32.mrf.mxu3  ;;  %1496 = vmatmul.f32.gmra.mxu2 %v1228_v22 }
 0xb3c   :  { %1559 = vmatmul.f32.gmra.mxu1 %v1323_v23 }
 0xb3d   :  { %1434 = vmatmul.f32.gmra.mxu0 %v2899_v11 }
 0xb42   :  { %v1231_v24 = vpop.f32.mrf.mxu2 }
 0xb43   :  { %v1326_v25 = vpop.f32.mrf.mxu3  ;;  %1499 = vmatmul.f32.gmra.mxu2 %v1231_v24 }
 0xb44   :  { %1562 = vmatmul.f32.gmra.mxu1 %v1326_v25 }
 0xb45   :  { %1437 = vmatmul.f32.gmra.mxu0 %v1288_v13 }
 0xb4a   :  { %v1233_v26 = vpop.f32.mrf.mxu2 }
 0xb4b   :  { %v1328_v27 = vpop.f32.mrf.mxu3  ;;  %1502 = vmatmul.f32.gmra.mxu2 %v1233_v26 }
 0xb4c   :  { %1565 = vmatmul.f32.gmra.mxu1 %v1328_v27 }
 0xb4d   :  { %1440 = vmatmul.f32.gmra.mxu0 %v1291_v53 }
 0xb52   :  { %v1236_v28 = vpop.f32.mrf.mxu2 }
 0xb53   :  { %v1331_v4 = vpop.f32.mrf.mxu3  ;;  %1505 = vmatmul.f32.gmra.mxu2 %v1236_v28 }
 0xb54   :  { %1568 = vmatmul.f32.gmra.mxu1 %v1331_v4 }
 0xb55   :  { %1443 = vmatmul.f32.gmra.mxu0 %v1293_v51 }
 0xb5a   :  { %v1238_v29 = vpop.f32.mrf.mxu2 }
 0xb5b   :  { %v1333_v30 = vpop.f32.mrf.mxu3  ;;  %1508 = vmatmul.f32.gmra.mxu2 %v1238_v29 }
 0xb5c   :  { %1571 = vmatmul.f32.gmra.mxu1 %v1333_v30 }
 0xb5d   :  { %1446 = vmatmul.f32.gmra.mxu0 %v1296_v50 }
 0xb62   :  { %v1241_v1 = vpop.f32.mrf.mxu2 }
 0xb63   :  { %v1336_v31 = vpop.f32.mrf.mxu3  ;;  %1511 = vmatmul.f32.gmra.mxu2 %v1241_v1 }
 0xb64   :  { %1574 = vmatmul.f32.gmra.mxu1 %v1336_v31 }
 0xb65   :  { %1449 = vmatmul.f32.gmra.mxu0 %v1298_v61 }
 0xb6a   :  { %v1243_v32 = vpop.f32.mrf.mxu2  ;;  %v1405_v8 = vpop.f32.mrf.mxu0 }
 0xb6b   :  { %v1338_v33 = vpop.f32.mrf.mxu3  ;;  %1514 = vmatmul.f32.gmra.mxu2 %v1243_v32 }
 0xb6c   :  { %1577 = vmatmul.f32.gmra.mxu1 %v1338_v33 }
 0xb72   :  { %v1408_v5 = vpop.f32.mrf.mxu0 }
 0xb73   :  { %v1341_v34 = vpop.f32.mrf.mxu3 }
 0xb74   :  { %1580 = vmatmul.f32.gmra.mxu1 %v1341_v34 }
 0xb76   :  { %v1470_v41 = vpop.f32.mrf.mxu2 }
 0xb77   :  { %v1471_v39 = vadd.f32 %v1470_v41, %v1405_v8 }
 0xb7a   :  { %v1411_v6 = vpop.f32.mrf.mxu0 }
 0xb7b   :  { %v1343_v40 = vpop.f32.mrf.mxu3 }
 0xb7c   :  { %1583 = vmatmul.f32.gmra.mxu1 %v1343_v40 }
 0xb7e   :  { %v1473_v55 = vpop.f32.mrf.mxu2 }
 0xb7f   :  { %v1474_v7 = vadd.f32 %v1473_v55, %v1408_v5 }
 0xb82   :  { %v1414_v10 = vpop.f32.mrf.mxu0 }
 0xb83   :  { %v1346_v42 = vpop.f32.mrf.mxu3 }
 0xb84   :  { %1586 = vmatmul.f32.gmra.mxu1 %v1346_v42 }
 0xb86   :  { %v1476_v47 = vpop.f32.mrf.mxu2 }
 0xb87   :  { %v1477_v13 = vadd.f32 %v1476_v47, %v1411_v6 }
 0xb8a   :  { %v1417_v54 = vpop.f32.mrf.mxu0 }
 0xb8b   :  { %v1348_v43 = vpop.f32.mrf.mxu3 }
 0xb8c   :  { %1589 = vmatmul.f32.gmra.mxu1 %v1348_v43 }
 0xb8e   :  { %v1479_v49 = vpop.f32.mrf.mxu2 }
 0xb8f   :  { %v1480_v16 = vadd.f32 %v1479_v49, %v1414_v10 }
 0xb92   :  { %v1420_v45 = vpop.f32.mrf.mxu0 }
 0xb93   :  { %v1351_v0 = vpop.f32.mrf.mxu3 }
 0xb94   :  { %1592 = vmatmul.f32.gmra.mxu1 %v1351_v0 }
 0xb96   :  { %v1482_v63 = vpop.f32.mrf.mxu2 }
 0xb97   :  { %v1483_v38 = vadd.f32 %v1482_v63, %v1417_v54 }
 0xb9a   :  { %v1423_v44 = vpop.f32.mrf.mxu0 }
 0xb9b   :  { %v1353_v57 = vpop.f32.mrf.mxu3 }
 0xb9c   :  { %1595 = vmatmul.f32.gmra.mxu1 %v1353_v57 }
 0xb9e   :  { %v1485_v59 = vpop.f32.mrf.mxu2 }
 0xb9f   :  { %v1486_v56 = vadd.f32 %v1485_v59, %v1420_v45 }
 0xba1   :  { %v1551_v11 = vpop.f32.mrf.mxu1 }
 0xba2   :  { %v1599_v12 = vadd.f32 %v1551_v11, %v1471_v39  ;;  %v1426_v50 = vpop.f32.mrf.mxu0 }
 0xba4   :  { %1615 = vst [vmem:[#allocation2] sm:$0xff] %v1599_v12 }
 0xba6   :  { %v1488_v52 = vpop.f32.mrf.mxu2 }
 0xba7   :  { %v1489_v46 = vadd.f32 %v1488_v52, %v1423_v44 }
 0xba9   :  { %v1554_v36 = vpop.f32.mrf.mxu1 }
 0xbaa   :  { %v1600_v48 = vadd.f32 %v1554_v36, %v1474_v7  ;;  %v1429_v2 = vpop.f32.mrf.mxu0 }
 0xbac   :  { %1616 = vst [vmem:[#allocation2 + $0x8] sm:$0xff] %v1600_v48 }
 0xbae   :  { %v1491_v9 = vpop.f32.mrf.mxu2 }
 0xbaf   :  { %v1492_v18 = vadd.f32 %v1491_v9, %v1426_v50 }
 0xbb1   :  { %v1557_v14 = vpop.f32.mrf.mxu1 }
 0xbb2   :  { %v1601_v15 = vadd.f32 %v1557_v14, %v1477_v13  ;;  %v1432_v21 = vpop.f32.mrf.mxu0 }
 0xbb4   :  { %1617 = vst [vmem:[#allocation2 + $0x10] sm:$0xff] %v1601_v15 }
 0xbb6   :  { %v1494_v62 = vpop.f32.mrf.mxu2 }
 0xbb7   :  { %v1495_v22 = vadd.f32 %v1494_v62, %v1429_v2 }
 0xbb9   :  { %v1560_v17 = vpop.f32.mrf.mxu1 }
 0xbba   :  { %v1602_v53 = vadd.f32 %v1560_v17, %v1480_v16  ;;  %v1435_v26 = vpop.f32.mrf.mxu0 }
 0xbbc   :  { %1618 = vst [vmem:[#allocation2 + $0x18] sm:$0xff] %v1602_v53 }
 0xbbe   :  { %v1497_v37 = vpop.f32.mrf.mxu2 }
 0xbbf   :  { %v1498_v27 = vadd.f32 %v1497_v37, %v1432_v21 }
 0xbc1   :  { %v1563_v51 = vpop.f32.mrf.mxu1 }
 0xbc2   :  { %v1603_v60 = vadd.f32 %v1563_v51, %v1483_v38  ;;  %v1438_v30 = vpop.f32.mrf.mxu0 }
 0xbc4   :  { %1619 = vst [vmem:[#allocation2 + $0x20] sm:$0xff] %v1603_v60 }
 0xbc6   :  { %v1500_v25 = vpop.f32.mrf.mxu2 }
 0xbc7   :  { %v1501_v1 = vadd.f32 %v1500_v25, %v1435_v26 }
 0xbc9   :  { %v1566_v58 = vpop.f32.mrf.mxu1 }
 0xbca   :  { %v1604_v61 = vadd.f32 %v1566_v58, %v1486_v56  ;;  %v1441_v40 = vpop.f32.mrf.mxu0 }
 0xbcc   :  { %1620 = vst [vmem:[#allocation2 + $0x28] sm:$0xff] %v1604_v61 }
 0xbce   :  { %v1503_v29 = vpop.f32.mrf.mxu2 }
 0xbcf   :  { %v1504_v34 = vadd.f32 %v1503_v29, %v1438_v30 }
 0xbd1   :  { %v1569_v3 = vpop.f32.mrf.mxu1 }
 0xbd2   :  { %v1605_v35 = vadd.f32 %v1569_v3, %v1489_v46  ;;  %v1444_v47 = vpop.f32.mrf.mxu0 }
 0xbd4   :  { %1621 = vst [vmem:[#allocation2 + $0x30] sm:$0xff] %v1605_v35 }
 0xbd6   :  { %v1506_v33 = vpop.f32.mrf.mxu2 }
 0xbd7   :  { %v1507_v42 = vadd.f32 %v1506_v33, %v1441_v40 }
 0xbd9   :  { %v1572_v19 = vpop.f32.mrf.mxu1 }
 0xbda   :  { %v1606_v20 = vadd.f32 %v1572_v19, %v1492_v18  ;;  %v1447_v10 = vpop.f32.mrf.mxu0 }
 0xbdc   :  { %1622 = vst [vmem:[#allocation2 + $0x38] sm:$0xff] %v1606_v20 }
 0xbde   :  { %v1509_v55 = vpop.f32.mrf.mxu2 }
 0xbdf   :  { %v1510_v0 = vadd.f32 %v1509_v55, %v1444_v47 }
 0xbe1   :  { %v1575_v23 = vpop.f32.mrf.mxu1 }
 0xbe2   :  { %v1607_v24 = vadd.f32 %v1575_v23, %v1495_v22  ;;  %v1450_v7 = vpop.f32.mrf.mxu0 }
 0xbe4   :  { %1623 = vst [vmem:[#allocation2 + $0x40] sm:$0xff] %v1607_v24 }
 0xbe6   :  { %v1512_v49 = vpop.f32.mrf.mxu2 }
 0xbe7   :  { %v1513_v39 = vadd.f32 %v1512_v49, %v1447_v10 }
 0xbe9   :  { %v1578_v28 = vpop.f32.mrf.mxu1 }
 0xbea   :  { %v1608_v4 = vadd.f32 %v1578_v28, %v1498_v27 }
 0xbec   :  { %1624 = vst [vmem:[#allocation2 + $0x48] sm:$0xff] %v1608_v4 }
 0xbee   :  { %v1515_v63 = vpop.f32.mrf.mxu2 }
 0xbef   :  { %v1516_v54 = vadd.f32 %v1515_v63, %v1450_v7 }
 0xbf1   :  { %v1581_v31 = vpop.f32.mrf.mxu1 }
 0xbf2   :  { %v1609_v32 = vadd.f32 %v1581_v31, %v1501_v1 }
 0xbf4   :  { %1625 = vst [vmem:[#allocation2 + $0x50] sm:$0xff] %v1609_v32 }
 0xbf9   :  { %v1584_v41 = vpop.f32.mrf.mxu1 }
 0xbfa   :  { %v1610_v8 = vadd.f32 %v1584_v41, %v1504_v34 }
 0xbfc   :  { %1626 = vst [vmem:[#allocation2 + $0x58] sm:$0xff] %v1610_v8 }
 0xc01   :  { %v1587_v5 = vpop.f32.mrf.mxu1 }
 0xc02   :  { %v1611_v43 = vadd.f32 %v1587_v5, %v1507_v42 }
 0xc04   :  { %1627 = vst [vmem:[#allocation2 + $0x60] sm:$0xff] %v1611_v43 }
 0xc09   :  { %v1590_v6 = vpop.f32.mrf.mxu1 }
 0xc0a   :  { %v1612_v57 = vadd.f32 %v1590_v6, %v1510_v0 }
 0xc0c   :  { %1628 = vst [vmem:[#allocation2 + $0x68] sm:$0xff] %v1612_v57 }
 0xc11   :  { %v1593_v11 = vpop.f32.mrf.mxu1 }
 0xc12   :  { %v1613_v12 = vadd.f32 %v1593_v11, %v1513_v39 }
 0xc14   :  { %1629 = vst [vmem:[#allocation2 + $0x70] sm:$0xff] %v1613_v12 }
 0xc19   :  { %v1596_v36 = vpop.f32.mrf.mxu1 }
 0xc1a   :  { %v1614_v48 = vadd.f32 %v1596_v36, %v1516_v54 }
 0xc1c   :  { %1630 = vst [vmem:[#allocation2 + $0x78] sm:$0xff] %v1614_v48 }
 0xc1d   :  { %1643 = dma.vmem_to_hbm [thread:$0]  %s1636_s20, 2048, %s1638_s1, [#allocation3], %s1844_s0, %s1844_s0, %s1845_s30  }
 0xc1e   :  { %1838 = dma.done.wait [#allocation3], 2048  }
 0xc1f   :  { %1839 = vsyncadd [#allocation3], 4294965248 }
 0xc20   :  { %1840 = dma.done.wait [#allocation5], 512  }
 0xc21   :  { %1841 = vsyncadd [#allocation5], 4294966784 }
 0xc22   :  { %1665 = vsyncpa [#allocation3], 1 }
 0xc23   :  { %1666 = vsyncpa [#allocation5], 1 }

</bundles_post_ra>
